<compile_context>
chip_gen: v6e
topology: v6e:2x2x1
jax: 0.10.0
libtpu: 0.0.40
codegen_flags: <defaults>
</compile_context>

<pallas_src>
import jax
import jax.numpy as jnp
from jax.experimental import pallas as pl
from jax.experimental.pallas import tpu as pltpu


# ---------------------------------------------------------------------------
# Fused kernel: pool+conv1x1+BN+ReLU  ->  fc1 (K-chunked)  ->  ReLU  ->  fc2
# ---------------------------------------------------------------------------
def inception_aux_kernel(x_ref, wpc_ref, scale_ref, bias_ref,
                         w1_ref, b1_ref, w2_ref, b2_ref, o_ref, acc_ref):
    # x_ref:     (nt, bins*G)   input pixels for this chunk's pooling bins
    # wpc_ref:   (bins*G, kc)   block-diag fused pool(4,4)+conv1x1 weight
    # scale_ref: (1, kc)        folded BN scale, tiled per bin (lane broadcast)
    # bias_ref:  (1, kc)        folded BN bias,  tiled per bin
    # w1_ref:    (kc, hidden)   bf16 fc1 weight chunk (rows permuted to match
    #                           the channels-last flatten)
    # b1_ref:    (1, hidden)    fc1 bias
    # w2_ref:    (hidden, nc)   bf16 fc2 weight
    # b2_ref:    (1, nc)        fc2 bias
    # o_ref:     (nt, nc)       logits
    # acc_ref:   (nt, hidden)   f32 fc1 accumulator (VMEM scratch)
    k = pl.program_id(1)

    @pl.when(k == 0)
    def _init():
        acc_ref[...] = jnp.zeros_like(acc_ref)

    # adaptive_avg_pool(4,4) + 1x1 conv for the pooling bins of this K chunk,
    # channels-last (lane-dense) result of shape (nt, kc)
    pc = jnp.dot(x_ref[...], wpc_ref[...], preferred_element_type=jnp.float32)
    # folded BatchNorm (eval running stats) + ReLU
    h = jnp.maximum(pc * scale_ref[...] + bias_ref[...], 0.0)

    # fc1 partial product for this K chunk; bf16 MXU inputs, f32 accumulation
    acc_ref[...] += jnp.dot(h.astype(w1_ref.dtype), w1_ref[...],
                            preferred_element_type=jnp.float32)

    @pl.when(k == pl.num_programs(1) - 1)
    def _finalize():
        h1 = jnp.maximum(acc_ref[...] + b1_ref[...], 0.0)      # fc1 bias + ReLU
        # F.dropout(p=0.7, training=False) -> identity (eval-mode semantics)
        out = jnp.dot(h1.astype(w2_ref.dtype), w2_ref[...],
                      preferred_element_type=jnp.float32) + b2_ref[...]
        o_ref[...] = out.astype(o_ref.dtype)


# ---------------------------------------------------------------------------
# Wrapper
# ---------------------------------------------------------------------------
def inception_aux_forward(x, params):
    """x: (N, Cin, H, W) float32 NCHW, params from fold_params()."""
    n, cin, hh, ww = x.shape
    assert hh % 4 == 0 and ww % 4 == 0, "spatial dims must be divisible by 4"
    g = (hh // 4) * (ww // 4)                     # pixels per pooling bin
    big_g = g * cin

    kc = params["bn_scale_t"].shape[1]            # fc1 K-chunk size (e.g. 512)
    bins = kc // 128                              # pooling bins per chunk
    hidden = params["w1p"].shape[1]               # 1024
    kdim = params["w1p"].shape[0]                 # 2048
    nc = params["w2t"].shape[1]
    chunk_cols = bins * big_g
    assert kdim % kc == 0 and 16 % bins == 0
    assert chunk_cols % 128 == 0, "bins*g*Cin must be a multiple of 128"

    # Layout plumbing only (no arithmetic): NCHW -> (N, 16*g*Cin) where the
    # column index is p*(g*Cin) + gi*Cin + c  (p = pooling bin, gi = pixel
    # within bin, c = input channel). Pooling/averaging itself happens inside
    # the kernel via the fused weight.
    xr = (x.astype(jnp.float32)
           .reshape(n, cin, 4, hh // 4, 4, ww // 4)
           .transpose(0, 2, 4, 3, 5, 1)           # (n, hb, wb, hi, wi, c)
           .reshape(n, 16 * big_g))

    nt = 8 if (n > 8 and n % 8 == 0) else n       # N tile (parallel -> 2 TCs on v7x)
    grid = (n // nt, kdim // kc)                  # reduction axis last, 'arbitrary'

    return pl.pallas_call(
        inception_aux_kernel,
        out_shape=jax.ShapeDtypeStruct((n, nc), jnp.float32),
        grid_spec=pltpu.PrefetchScalarGridSpec(
            num_scalar_prefetch=0,
            grid=grid,
            in_specs=[
                pl.BlockSpec((nt, chunk_cols), lambda i, k: (i, k)),   # x chunk
                pl.BlockSpec((chunk_cols, kc), lambda i, k: (0, 0)),   # pool+conv
                pl.BlockSpec((1, kc), lambda i, k: (0, 0)),            # bn scale
                pl.BlockSpec((1, kc), lambda i, k: (0, 0)),            # bn bias
                pl.BlockSpec((kc, hidden), lambda i, k: (k, 0)),       # w1 chunk
                pl.BlockSpec((1, hidden), lambda i, k: (0, 0)),        # b1
                pl.BlockSpec((hidden, nc), lambda i, k: (0, 0)),       # w2
                pl.BlockSpec((1, nc), lambda i, k: (0, 0)),            # b2
            ],
            out_specs=pl.BlockSpec((nt, nc), lambda i, k: (i, 0)),
            scratch_shapes=[pltpu.VMEM((nt, hidden), jnp.float32)],
        ),
        compiler_params=pltpu.CompilerParams(
            dimension_semantics=("parallel", "arbitrary")),
    )(xr, params["wpc"], params["bn_scale_t"], params["bn_bias_t"],
      params["w1p"], params["b1"], params["w2t"], params["b2"])


# ---------------------------------------------------------------------------
# Parameters: raw (PyTorch-like) + one-time folding into kernel layout
# ---------------------------------------------------------------------------
def init_raw_params(key, in_channels, num_classes=7):
    ks = jax.random.split(key, 8)
    wc = jax.random.normal(ks[0], (128, in_channels), jnp.float32) * 0.1
    gamma = 1.0 + 0.1 * jax.random.normal(ks[1], (128,), jnp.float32)
    beta = 0.1 * jax.random.normal(ks[2], (128,), jnp.float32)
    mean = 0.1 * jax.random.normal(ks[3], (128,), jnp.float32)
    var = jnp.abs(jax.random.normal(ks[4], (128,), jnp.float32)) + 0.5
    w1 = jax.random.normal(ks[5], (1024, 2048), jnp.float32) * 0.02
    b1 = 0.01 * jax.random.normal(ks[6], (1024,), jnp.float32)
    w2 = jax.random.normal(ks[7], (num_classes, 1024), jnp.float32) * 0.02
    b2 = jnp.zeros((num_classes,), jnp.float32)
    return dict(wc=wc, gamma=gamma, beta=beta, mean=mean, var=var,
                w1=w1, b1=b1, w2=w2, b2=b2)


def fold_params(raw, hh, ww, *, kc=512, eps=1e-3):
    """One-time weight preprocessing (done once, not per forward call)."""
    cin = raw["wc"].shape[1]
    hidden = raw["w1"].shape[0]                          # 1024
    kdim = raw["w1"].shape[1]                            # 2048 = 16 bins * 128 ch
    g = (hh // 4) * (ww // 4)
    bins = kc // 128

    # Fused adaptive_avg_pool(4,4) + conv1x1 weight for ONE bin: (g*cin, 128),
    # then block-diagonal over the `bins` bins handled per K chunk.
    wpc_bin = jnp.tile(raw["wc"].T / float(g), (g, 1))           # (g*cin, 128)
    wpc = jnp.kron(jnp.eye(bins, dtype=jnp.float32), wpc_bin)    # (bins*g*cin, kc)

    # Folded BatchNorm (eval), tiled per bin so it broadcasts along lanes.
    scale = raw["gamma"] / jnp.sqrt(raw["var"] + eps)            # (128,)
    bias = raw["beta"] - scale * raw["mean"]
    scale_t = jnp.tile(scale, bins).reshape(1, kc)
    bias_t = jnp.tile(bias, bins).reshape(1, kc)

    # fc1 weight: transpose and permute rows from PyTorch channel-major order
    # (c*16 + p) to the kernel's channels-last order (p*128 + c), cast bf16.
    w1p = (raw["w1"].T.reshape(128, 16, hidden)
                    .transpose(1, 0, 2)
                    .reshape(kdim, hidden)).astype(jnp.bfloat16)

    return dict(
        wpc=wpc.astype(jnp.float32),
        bn_scale_t=scale_t.astype(jnp.float32),
        bn_bias_t=bias_t.astype(jnp.float32),
        w1p=w1p,
        b1=raw["b1"].reshape(1, hidden).astype(jnp.float32),
        w2t=raw["w2"].T.astype(jnp.bfloat16),
        b2=raw["b2"].reshape(1, -1).astype(jnp.float32),
    )


# ---------------------------------------------------------------------------
# Pure-JAX reference (mirrors the PyTorch eval forward, all f32)
# ---------------------------------------------------------------------------
def reference_forward(x, raw, eps=1e-3):
    n, cin, hh, ww = x.shape
    xp = x.reshape(n, cin, 4, hh // 4, 4, ww // 4).mean(axis=(3, 5))   # (n,cin,4,4)
    conv = jnp.einsum("oc,nchw->nohw", raw["wc"], xp)
    scale = raw["gamma"] / jnp.sqrt(raw["var"] + eps)
    bias = raw["beta"] - scale * raw["mean"]
    y = jnp.maximum(conv * scale[None, :, None, None] + bias[None, :, None, None], 0.0)
    flat = y.reshape(n, -1)                                            # channel-major
    h1 = jnp.maximum(flat @ raw["w1"].T + raw["b1"], 0.0)
    return h1 @ raw["w2"].T + raw["b2"]


if __name__ == "__main__":
    key = jax.random.PRNGKey(0)
    k_x, k_p = jax.random.split(key)

    N, CIN, H, W = 2, 4, 16, 16
    x = jax.random.normal(k_x, (N, CIN, H, W), jnp.float32)            # NCHW
    raw = init_raw_params(k_p, CIN, num_classes=7)
    params = fold_params(raw, H, W)

    out = jax.block_until_ready(inception_aux_forward(x, params))
    assert out.shape == (N, 7) and out.dtype == jnp.float32

    ref = jax.block_until_ready(reference_forward(x, raw))
    assert jnp.allclose(out, ref, atol=5e-2, rtol=5e-2), \
        f"max |err| = {jnp.max(jnp.abs(out - ref))}"
    print("KERNEL_OK")
</pallas_src>

<mosaic_0001>
module attributes {stable_mosaic.version = 11 : i64} {
  func.func @inception_aux_kernel(%arg0: i32, %arg1: i32, %arg2: memref<2x256xf32, #tpu.memory_space<vmem>>, %arg3: memref<256x512xf32, #tpu.memory_space<vmem>>, %arg4: memref<1x512xf32, #tpu.memory_space<vmem>>, %arg5: memref<1x512xf32, #tpu.memory_space<vmem>>, %arg6: memref<512x1024xbf16, #tpu.memory_space<vmem>>, %arg7: memref<1x1024xf32, #tpu.memory_space<vmem>>, %arg8: memref<1024x7xbf16, #tpu.memory_space<vmem>>, %arg9: memref<1x7xf32, #tpu.memory_space<vmem>>, %arg10: memref<2x7xf32, #tpu.memory_space<vmem>>, %arg11: memref<2x1024xf32, #tpu.memory_space<vmem>>) attributes {dimension_semantics = [#tpu.dimension_semantics<parallel>, #tpu.dimension_semantics<arbitrary>], iteration_bounds = array<i64: 1, 4>, scalar_prefetch = 0 : i64, scratch_operands = 1 : i64, tpu.core_type = #tpu.core_type<tc>, window_params = [{transform_indices = @transform_0, window_bounds = array<i64: 2, 256>}, {pipeline_mode = #tpu.pipeline_mode<synchronous>, transform_indices = @transform_1, window_bounds = array<i64: 256, 512>}, {pipeline_mode = #tpu.pipeline_mode<synchronous>, transform_indices = @transform_2, window_bounds = array<i64: 1, 512>}, {pipeline_mode = #tpu.pipeline_mode<synchronous>, transform_indices = @transform_3, window_bounds = array<i64: 1, 512>}, {transform_indices = @transform_4, window_bounds = array<i64: 512, 1024>}, {pipeline_mode = #tpu.pipeline_mode<synchronous>, transform_indices = @transform_5, window_bounds = array<i64: 1, 1024>}, {pipeline_mode = #tpu.pipeline_mode<synchronous>, transform_indices = @transform_6, window_bounds = array<i64: 1024, 7>}, {pipeline_mode = #tpu.pipeline_mode<synchronous>, transform_indices = @transform_7, window_bounds = array<i64: 1, 7>}, {transform_indices = @transform_8, window_bounds = array<i64: 2, 7>}]} {
    %c0_i32 = arith.constant 0 : i32
    %0 = arith.cmpi eq, %arg1, %c0_i32 : i32
    %1 = arith.extui %0 : i1 to i32
    %c0_i32_0 = arith.constant 0 : i32
    %2 = arith.cmpi ne, %1, %c0_i32_0 : i32
    scf.if %2 {
      %cst_17 = arith.constant 0.000000e+00 : f32
      %23 = vector.broadcast %cst_17 : f32 to vector<2x1024xf32>
      %c0_18 = arith.constant 0 : index
      %c0_19 = arith.constant 0 : index
      %24 = vector.load %arg11[%c0_18, %c0_19] : memref<2x1024xf32, #tpu.memory_space<vmem>>, vector<2x1024xf32>
      tpu.vector_store %arg11[%c0_18, %c0_19], %23 {strides = array<i32>} : memref<2x1024xf32, #tpu.memory_space<vmem>>, vector<2x1024xf32>,
    } else {
    }
    %c0 = arith.constant 0 : index
    %c0_1 = arith.constant 0 : index
    %3 = vector.load %arg2[%c0, %c0_1] : memref<2x256xf32, #tpu.memory_space<vmem>>, vector<2x256xf32>
    %c0_2 = arith.constant 0 : index
    %c0_3 = arith.constant 0 : index
    %4 = vector.load %arg3[%c0_2, %c0_3] : memref<256x512xf32, #tpu.memory_space<vmem>>, vector<256x512xf32>
    %cst = arith.constant dense<0.000000e+00> : vector<2x512xf32>
    %5 = tpu.matmul %3, %4, %cst {dimension_numbers = #tpu.dot_dimension_numbers<[1], [0], [0], [1], [0, 0, 1, 1], [], []>} : vector<2x256xf32>, vector<256x512xf32>, vector<2x512xf32> -> vector<2x512xf32>
    %c0_4 = arith.constant 0 : index
    %c0_5 = arith.constant 0 : index
    %6 = vector.load %arg4[%c0_4, %c0_5] : memref<1x512xf32, #tpu.memory_space<vmem>>, vector<1x512xf32>
    %7 = vector.broadcast %6 : vector<1x512xf32> to vector<2x512xf32>
    %8 = arith.mulf %5, %7 : vector<2x512xf32>
    %c0_6 = arith.constant 0 : index
    %c0_7 = arith.constant 0 : index
    %9 = vector.load %arg5[%c0_6, %c0_7] : memref<1x512xf32, #tpu.memory_space<vmem>>, vector<1x512xf32>
    %10 = vector.broadcast %9 : vector<1x512xf32> to vector<2x512xf32>
    %11 = arith.addf %8, %10 : vector<2x512xf32>
    %cst_8 = arith.constant 0.000000e+00 : f32
    %12 = vector.broadcast %cst_8 : f32 to vector<2x512xf32>
    %13 = arith.maximumf %11, %12 : vector<2x512xf32>
    %c0_9 = arith.constant 0 : index
    %c0_10 = arith.constant 0 : index
    %14 = vector.load %arg11[%c0_9, %c0_10] : memref<2x1024xf32, #tpu.memory_space<vmem>>, vector<2x1024xf32>
    %15 = arith.truncf %13 : vector<2x512xf32> to vector<2x512xbf16>
    %c0_11 = arith.constant 0 : index
    %c0_12 = arith.constant 0 : index
    %16 = vector.load %arg6[%c0_11, %c0_12] : memref<512x1024xbf16, #tpu.memory_space<vmem>>, vector<512x1024xbf16>
    %cst_13 = arith.constant dense<0.000000e+00> : vector<2x1024xf32>
    %17 = tpu.matmul %15, %16, %cst_13 {dimension_numbers = #tpu.dot_dimension_numbers<[1], [0], [0], [1], [0, 0, 1, 1], [], []>} : vector<2x512xbf16>, vector<512x1024xbf16>, vector<2x1024xf32> -> vector<2x1024xf32>
    %18 = arith.addf %14, %17 : vector<2x1024xf32>
    %c0_14 = arith.constant 0 : index
    %c0_15 = arith.constant 0 : index
    %19 = vector.load %arg11[%c0_14, %c0_15] : memref<2x1024xf32, #tpu.memory_space<vmem>>, vector<2x1024xf32>
    tpu.vector_store %arg11[%c0_14, %c0_15], %18 {strides = array<i32>} : memref<2x1024xf32, #tpu.memory_space<vmem>>, vector<2x1024xf32>,
    %c3_i32 = arith.constant 3 : i32
    %20 = arith.cmpi eq, %arg1, %c3_i32 : i32
    %21 = arith.extui %20 : i1 to i32
    %c0_i32_16 = arith.constant 0 : i32
    %22 = arith.cmpi ne, %21, %c0_i32_16 : i32
    scf.if %22 {
      %c0_17 = arith.constant 0 : index
      %c0_18 = arith.constant 0 : index
      %23 = vector.load %arg11[%c0_17, %c0_18] : memref<2x1024xf32, #tpu.memory_space<vmem>>, vector<2x1024xf32>
      %c0_19 = arith.constant 0 : index
      %c0_20 = arith.constant 0 : index
      %24 = vector.load %arg7[%c0_19, %c0_20] : memref<1x1024xf32, #tpu.memory_space<vmem>>, vector<1x1024xf32>
      %25 = vector.broadcast %24 : vector<1x1024xf32> to vector<2x1024xf32>
      %26 = arith.addf %23, %25 : vector<2x1024xf32>
      %cst_21 = arith.constant 0.000000e+00 : f32
      %27 = vector.broadcast %cst_21 : f32 to vector<2x1024xf32>
      %28 = arith.maximumf %26, %27 : vector<2x1024xf32>
      %29 = arith.truncf %28 : vector<2x1024xf32> to vector<2x1024xbf16>
      %c0_22 = arith.constant 0 : index
      %c0_23 = arith.constant 0 : index
      %30 = vector.load %arg8[%c0_22, %c0_23] : memref<1024x7xbf16, #tpu.memory_space<vmem>>, vector<1024x7xbf16>
      %cst_24 = arith.constant dense<0.000000e+00> : vector<2x7xf32>
      %31 = tpu.matmul %29, %30, %cst_24 {dimension_numbers = #tpu.dot_dimension_numbers<[1], [0], [0], [1], [0, 0, 1, 1], [], []>} : vector<2x1024xbf16>, vector<1024x7xbf16>, vector<2x7xf32> -> vector<2x7xf32>
      %c0_25 = arith.constant 0 : index
      %c0_26 = arith.constant 0 : index
      %32 = vector.load %arg9[%c0_25, %c0_26] : memref<1x7xf32, #tpu.memory_space<vmem>>, vector<1x7xf32>
      %33 = vector.broadcast %32 : vector<1x7xf32> to vector<2x7xf32>
      %34 = arith.addf %31, %33 : vector<2x7xf32>
      %c0_27 = arith.constant 0 : index
      %c0_28 = arith.constant 0 : index
      %35 = vector.load %arg10[%c0_27, %c0_28] : memref<2x7xf32, #tpu.memory_space<vmem>>, vector<2x7xf32>
      tpu.vector_store %arg10[%c0_27, %c0_28], %34 {strides = array<i32>} : memref<2x7xf32, #tpu.memory_space<vmem>>, vector<2x7xf32>,
    } else {
    }
    return
  }
  func.func @transform_0(%arg0: i32, %arg1: i32) -> (i32, i32) {
    %c0_i32 = arith.constant 0 : i32
    return %arg0, %arg1 : i32, i32
  }
  func.func @transform_1(%arg0: i32, %arg1: i32) -> (i32, i32) {
    %c0_i32 = arith.constant 0 : i32
    %c0_i32_0 = arith.constant 0 : i32
    %c0_i32_1 = arith.constant 0 : i32
    return %c0_i32, %c0_i32_0 : i32, i32
  }
  func.func @transform_2(%arg0: i32, %arg1: i32) -> (i32, i32) {
    %c0_i32 = arith.constant 0 : i32
    %c0_i32_0 = arith.constant 0 : i32
    %c0_i32_1 = arith.constant 0 : i32
    return %c0_i32, %c0_i32_0 : i32, i32
  }
  func.func @transform_3(%arg0: i32, %arg1: i32) -> (i32, i32) {
    %c0_i32 = arith.constant 0 : i32
    %c0_i32_0 = arith.constant 0 : i32
    %c0_i32_1 = arith.constant 0 : i32
    return %c0_i32, %c0_i32_0 : i32, i32
  }
  func.func @transform_4(%arg0: i32, %arg1: i32) -> (i32, i32) {
    %c0_i32 = arith.constant 0 : i32
    %c0_i32_0 = arith.constant 0 : i32
    return %arg1, %c0_i32 : i32, i32
  }
  func.func @transform_5(%arg0: i32, %arg1: i32) -> (i32, i32) {
    %c0_i32 = arith.constant 0 : i32
    %c0_i32_0 = arith.constant 0 : i32
    %c0_i32_1 = arith.constant 0 : i32
    return %c0_i32, %c0_i32_0 : i32, i32
  }
  func.func @transform_6(%arg0: i32, %arg1: i32) -> (i32, i32) {
    %c0_i32 = arith.constant 0 : i32
    %c0_i32_0 = arith.constant 0 : i32
    %c0_i32_1 = arith.constant 0 : i32
    return %c0_i32, %c0_i32_0 : i32, i32
  }
  func.func @transform_7(%arg0: i32, %arg1: i32) -> (i32, i32) {
    %c0_i32 = arith.constant 0 : i32
    %c0_i32_0 = arith.constant 0 : i32
    %c0_i32_1 = arith.constant 0 : i32
    return %c0_i32, %c0_i32_0 : i32, i32
  }
  func.func @transform_8(%arg0: i32, %arg1: i32) -> (i32, i32) {
    %c0_i32 = arith.constant 0 : i32
    %c0_i32_0 = arith.constant 0 : i32
    return %arg0, %c0_i32 : i32, i32
  }
}

</mosaic_0001>

<bundles_post_ra>
// kernel: tpu_custom_call.1
= control target key start
LH: loop header
LB: loop body
LE: loop exit
PB: predicated region body
PF: predicated region fallthrough
CT: control target
= control target key end

     0   :  { %s5369_s0 = inlined_call_operand.hbm [shape: f32[2,1024], index: 0, kind: input, shape index: {}]   ;;  %s5370_s1 = inlined_call_operand.hbm [shape: f32[256,512], index: 1, kind: input, shape index: {}]   ;;  %s5371_s2 = inlined_call_operand.hbm [shape: f32[1,512], index: 2, kind: input, shape index: {}]   ;;  %s5372_s3 = inlined_call_operand.hbm [shape: f32[1,512], index: 3, kind: input, shape index: {}]   ;;  %s5373_s4 = inlined_call_operand.hbm [shape: bf16[2048,1024], index: 4, kind: input, shape index: {}]   ;;  %s5374_s5 = inlined_call_operand.hbm [shape: f32[1,1024], index: 5, kind: input, shape index: {}]   ;;  %s5375_s6 = inlined_call_operand.vmem [shape: bf16[1024,7], index: 6, kind: input, shape index: {}]   ;;  %s5376_s7 = inlined_call_operand.hbm [shape: f32[1,7], index: 7, kind: input, shape index: {}]   ;;  %s5377_s8 = inlined_call_operand.hbm [shape: f32[2,7], index: 8, kind: output, shape index: {}]  }
   0x1   :  { %5383 = sst [smem:[#allocation24_spill]] %s5370_s1 }
   0x2   :  { %5384 = sst [smem:[#allocation25_spill]] %s5371_s2 }
   0x3   :  { %5385 = sst [smem:[#allocation26_spill]] %s5372_s3 }
   0x4   :  { %13 = vsyncpa [#allocation4], 0 }
   0x5   :  { %15 = vsyncpa [#allocation4 + $0x1], 0 }
   0x6   :  { %16 = vsyncpa [#allocation7], 0 }
   0x7   :  { %17 = vsyncpa [#allocation10], 0 }
   0x8   :  { %18 = vsyncpa [#allocation5], 0  ;;  %s4622_s27 = smov 0   ;;  %s4624_s28 = smov 0  }
   0x9   :  { %s4626_s29 = smov 0   ;;  %s4628_s30 = smov 0  }
   0xa   :  { %s4630_s9 = smov 0   ;;  %s4632_s10 = smov 0  }
   0xb LB: > { %s4653_s11 = sadd.s32 4294967295, %s4563_s10   ;;  %p3652_p0 = scmp.ge.s32.totalorder %s4563_s10, 1  ;;  %s4563_s10 = sphi %s4632_s10, %s24_s10   ;;  %s4559_s9 = sphi %s4630_s9, %s5415_s9   ;;  %s4555_s30 = sphi %s4628_s30, %s5414_s30   ;;  %s4551_s29 = sphi %s4626_s29, %s5413_s29   ;;  %s4547_s28 = sphi %s4624_s28, %s5412_s28   ;;  %s4543_s27 = sphi %s4622_s27, %s5411_s27  }
   0xc   : > { %p5378_p1 = scmp.eq.s32.totalorder %s4653_s11, 0  ;;  %p247_p2 = scmp.lt.s32.totalorder %s4563_s10, 5 }
   0xd   : > { %s4565_s13 = smov [#allocation6]   ;;  %s4566_s16 = smov [#allocation8]  }
   0xe   : > { %p4658_p3 = pnand %p3652_p0, %p247_p2  ;;  %s259_s14 = sshll.u32 %s4565_s13, 4  ;;  %s260_s14 = int_to_ptr.vmem [resolvable:$true] %s259_s14 }
   0xf   : > { %s273_s17 = sshll.u32 %s4566_s16, 4  ;;  %s4567_s18 = smov [#allocation9]   ;;  %s274_s17 = int_to_ptr.vmem [resolvable:$true] %s273_s17 }
  0x10   : > { %s5386_s12 = scalar_select %p4658_p3, 1, 0 }
  0x11   : > { %p4121_p4 = pneg %p4658_p3  ;;  %s284_s19 = sshll.u32 %s4567_s18, 4  ;;  %s285_s19 = int_to_ptr.vmem [resolvable:$true] %s284_s19 }
  0x12   : > { %s4290_s21 = scalar_lea.vmem %s260_s14, 16384  ;;  %p4298_p10 = scmp.lt.s32.totalorder %s260_s14, %s260_s14 }
  0x13   : > { %p4666_p5 = pnand %p4121_p4, %p5378_p1  ;;  %p4291_p7 = scmp.ne.s32.totalorder %s260_s14, %s4290_s21 }
  0x14   : > { %p4299_p11 = scmp.lt.s32.totalorder %s4290_s21, %s4290_s21 }
  0x15   : > { %p4672_p6 = pneg %p4666_p5 }
  0x16   : > { %p4300_p12 = por %p4299_p11, %p4298_p10 }
  0x17   : > { %p4293_p8 = pnand %p4291_p7, %p4672_p6 }
  0x19   : > { %p4294_p9 = pneg %p4293_p8 }
  0x1b   : > { %p4301_p13 = pnand %p4300_p12, %p4294_p9 }
  0x1d   : > { %4304 = shalt.err (!%p4301_p13)
}
  0x1e   : > { %s5380_s22 = smov 512   ;;  %s5381_s23 = smov 32  }
  0x1f   : > { %s5389_s1 = sld [smem:[#allocation24_spill]]  ;;  %s4316_s26 = scalar_lea.vmem %s274_s17, 64 }
  0x20   : > { %p4317_p0 = scmp.ne.s32.totalorder %s274_s17, %s4316_s26  ;;  %p4324_p7 = scmp.lt.s32.totalorder %s274_s17, %s274_s17 }
  0x21   : > { %p4325_p8 = scmp.lt.s32.totalorder %s4316_s26, %s4316_s26 }
  0x22   : > { %p4319_p2 = pnand %p4317_p0, %p4672_p6 }
  0x23   : > { %p4326_p9 = por %p4325_p8, %p4324_p7 }
  0x24   : > { %p4320_p4 = pneg %p4319_p2 }
  0x25   : > { %4124 = dma.hbm_to_vmem [thread:$0]  (!%p4666_p5), %s5389_s1, 16384, %s260_s14, [#allocation7], %s5380_s22, %s5380_s22, %s5381_s23  }
  0x26   : > { %p4327_p10 = pnand %p4326_p9, %p4320_p4 }
  0x28   : > { %4330 = shalt.err (!%p4327_p10)
}
  0x29   : > { %s5390_s2 = sld [smem:[#allocation25_spill]]  ;;  %s4342_s18 = scalar_lea.vmem %s285_s19, 64 }
  0x2a   : > { %p4343_p11 = scmp.ne.s32.totalorder %s285_s19, %s4342_s18  ;;  %p4350_p0 = scmp.lt.s32.totalorder %s285_s19, %s285_s19 }
  0x2b   : > { %p4351_p2 = scmp.lt.s32.totalorder %s4342_s18, %s4342_s18 }
  0x2c   : > { %p4345_p12 = pnand %p4343_p11, %p4672_p6 }
  0x2d   : > { %p4352_p1 = por %p4351_p2, %p4350_p0 }
  0x2e   : > { %p4346_p13 = pneg %p4345_p12 }
  0x2f   : > { %4127 = dma.hbm_to_vmem [thread:$0]  (!%p4666_p5), %s5390_s2, 64, %s274_s17, [#allocation7]  }
  0x30   : > { %p4353_p3 = pnand %p4352_p1, %p4346_p13 }
  0x32   : > { %4356 = shalt.err (!%p4353_p3)
}
  0x33   : > { %s5391_s3 = sld [smem:[#allocation26_spill]]  ;;  %s33_s17 = sadd.s32 1, %s4559_s9 }
  0x34   : > { %p34_p1 = scmp.ge.s32.totalorder %s33_s17, 4  ;;  %s45_s24 = sadd.s32 1, %s4551_s29 }
  0x35   : > { %p52_p3 = scmp.ne.s32.totalorder %s4551_s29, %s4547_s28  ;;  %p53_p4 = scmp.eq.s32.totalorder %s4563_s10, 0 }
  0x36   : > { %s5417_s17 = smov (%p34_p1, %s33_s17), 0  ;;  %p58_p8 = scmp.ne.s32.totalorder %s4547_s28, %s4543_s27 }
  0x37   : > { %5392 = sst [smem:[#allocation22_spill]] %s5417_s17  ;;  %p4707_p7 = por %p53_p4, %p52_p3 }
  0x38   : > { %s41_s26 = ssub.s32 %s4559_s9, %s5417_s17  ;;  %p4149_p9 = scmp.lt.s32.totalorder %s4563_s10, 4 }
  0x39   : > { %4130 = dma.hbm_to_vmem [thread:$0]  (!%p4666_p5), %s5391_s3, 64, %s285_s19, [#allocation10]  }
  0x3a   : > { %p43_p10 = scmp.eq.s32.totalorder %s41_s26, 0  ;;  %p5394_p11 = scmp.eq.s32.totalorder %s4653_s11, 0 }
  0x3b   : > { %s320_s13 = sand.u32 1, %s4563_s10   ;;  %s322_s16 = sand.u32 1, %s4551_s29  }
  0x3c   : > { %p4718_p12 = por %p5394_p11, %p58_p8  ;;  %s3659_s14 = sshll.u32 %s322_s16, 2 }
  0x3d   : > { %s4725_s18 = scalar_select %p43_p10, %s4551_s29, %s45_s24  }
  0x3e   : > { %s4002_s21 = sshll.u32 %s4559_s9, 6  ;;  %s324_s27 = scalar_lea.vmem [#allocation3], %s3659_s14 }
  0x3f   : > { %5396 = sst [smem:[#allocation23_spill]] %s4725_s18  ;;  %s332_s1 = scalar_lea.hbm %s5369_s0, %s4002_s21 }
  0x40   : > { %s334_s2 = sshll.u32 %s324_s27, 4  ;;  %p4733_p13 = pnand %p4149_p9, %p4707_p7  ;;  %s335_s2 = int_to_ptr.vmem [resolvable:$true] %s334_s2 }
  0x41   : > { %s3662_s3 = sshll.u32 %s322_s16, 11  ;;  %s4004_s17 = sshll.u32 %s4559_s9, 15 }
  0x42   : > { %s4738_s24 = scalar_lea.sflag [#allocation4], %s320_s13  ;;  %p4359_p0 = pneg %p4733_p13 }
  0x43   : > { %s4370_s18 = scalar_lea.vmem %s335_s2, 64  ;;  %s4570_s22 = smov [#allocation3]  }
  0x44   : > { %p4371_p2 = scmp.ne.s32.totalorder %s335_s2, %s4370_s18  ;;  %s4375_s23 = sshll.u32 %s4570_s22, 4  ;;  %s4376_s23 = int_to_ptr.vmem [resolvable:$false] %s4375_s23 }
  0x45   : > { %s4377_s25 = scalar_lea.vmem %s4376_s23, 128  ;;  %p4378_p4 = scmp.lt.s32.totalorder %s335_s2, %s4376_s23 }
  0x46   : > { %p4373_p1 = pnand %p4371_p2, %p4359_p0  ;;  %p4379_p7 = scmp.lt.s32.totalorder %s4377_s25, %s4370_s18 }
  0x48   : > { %p4374_p3 = pneg %p4373_p1  ;;  %p4380_p8 = por %p4379_p7, %p4378_p4 }
  0x4a   : > { %p4381_p9 = pnand %p4380_p8, %p4374_p3 }
  0x4c   : > { %4384 = shalt.err (!%p4381_p9)
}
  0x4d   : > { %4140 = dma.hbm_to_vmem [thread:$0]  (!%p4733_p13), %s332_s1, 64, %s335_s2, %s4738_s24  }
  0x4e   : > { %s345_s13 = scalar_lea.vmem [#allocation11], %s3662_s3  ;;  %s4571_s14 = smov [#allocation12]  }
  0x4f   : > { %s353_s16 = sshll.u32 %s345_s13, 4  ;;  %s295_s21 = sshll.u32 %s4571_s14, 4  ;;  %s4748_s16 = int_to_ptr.vmem [resolvable:$true] %s353_s16  ;;  %s296_s21 = int_to_ptr.vmem [resolvable:$true] %s295_s21 }
  0x50   : > { %s4396_s27 = scalar_lea.vmem %s296_s21, 128  ;;  %p4404_p1 = scmp.lt.s32.totalorder %s296_s21, %s296_s21 }
  0x51   : > { %p4397_p10 = scmp.ne.s32.totalorder %s296_s21, %s4396_s27  ;;  %p4405_p3 = scmp.lt.s32.totalorder %s4396_s27, %s4396_s27 }
  0x53   : > { %p4399_p11 = pnand %p4397_p10, %p4672_p6  ;;  %p4406_p4 = por %p4405_p3, %p4404_p1 }
  0x55   : > { %p4400_p2 = pneg %p4399_p11 }
  0x57   : > { %p4407_p7 = pnand %p4406_p4, %p4400_p2 }
  0x59   : > { %4410 = shalt.err (!%p4407_p7)
}
  0x5a   : > { %4133 = dma.hbm_to_vmem [thread:$0]  (!%p4666_p5), %s5374_s5, 128, %s296_s21, [#allocation7]  }
  0x5b   : > { %s4572_s3 = smov [#allocation13]   ;;  %s4762_s25 = scalar_lea.hbm %s5373_s4, %s4004_s17 }
  0x5c   : > { %s309_s18 = sshll.u32 %s4572_s3, 4  ;;  %s310_s18 = int_to_ptr.vmem [resolvable:$true] %s309_s18 }
  0x5d   : > { %s4422_s13 = scalar_lea.vmem %s310_s18, 16  ;;  %s4429_s14 = scalar_lea.vmem %s310_s18, 32 }
  0x5e   : > { %p4423_p8 = scmp.ne.s32.totalorder %s310_s18, %s4422_s13  ;;  %p4430_p11 = scmp.lt.s32.totalorder %s310_s18, %s310_s18 }
  0x5f   : > { %p4431_p2 = scmp.lt.s32.totalorder %s4429_s14, %s4422_s13 }
  0x60   : > { %p4425_p9 = pnand %p4423_p8, %p4672_p6 }
  0x61   : > { %p4432_p1 = por %p4431_p2, %p4430_p11 }
  0x62   : > { %p4426_p10 = pneg %p4425_p9 }
  0x64   : > { %p4433_p3 = pnand %p4432_p1, %p4426_p10 }
  0x66   : > { %4436 = shalt.err (!%p4433_p3)
}
  0x67   : > { %4136 = dma.hbm_to_vmem [thread:$0]  (!%p4666_p5), %s5376_s7, 16, %s310_s18, [#allocation10]  }
  0x68   : > { %s4450_s17 = scalar_lea.vmem %s4748_s16, 32768  ;;  %s4573_s20 = smov [#allocation11]  }
  0x69   : > { %p4451_p4 = scmp.ne.s32.totalorder %s4748_s16, %s4450_s17  ;;  %s4455_s1 = sshll.u32 %s4573_s20, 4  ;;  %s4456_s1 = int_to_ptr.vmem [resolvable:$false] %s4455_s1 }
  0x6a   : > { %s4457_s2 = scalar_lea.vmem %s4456_s1, 65536  ;;  %p4458_p8 = scmp.lt.s32.totalorder %s4748_s16, %s4456_s1 }
  0x6b   : > { %p4453_p6 = pnand %p4451_p4, %p4359_p0  ;;  %p4459_p9 = scmp.lt.s32.totalorder %s4457_s2, %s4450_s17 }
  0x6d   : > { %p4454_p7 = pneg %p4453_p6  ;;  %p4460_p10 = por %p4459_p9, %p4458_p8 }
  0x6f   : > { %p4461_p11 = pnand %p4460_p10, %p4454_p7 }
  0x71   : > { %4464 = shalt.err (!%p4461_p11)
}
  0x72   : > { %s5398_s15 = smov 32   ;;  %s5399_s3 = smov 512  }
  0x73   : > { %4143 = dma.hbm_to_vmem [thread:$0]  (!%p4733_p13), %s4762_s25, 32768, %s4748_s16, %s4738_s24, %s5399_s3, %s5399_s3, %s5398_s15  }
  0x74   : > { %p5400_p5 = scmp.ne.s32.totalorder %s5386_s12, 0 }
  0x75   : > { %s367_s18 = sand.u32 (!%p5400_p5), 1, %s4653_s11   ;;  %s369_s22 = sand.u32 (!%p5400_p5), 1, %s4547_s28  }
  0x76   : > { %365 = sbr.rel (%p5400_p5) target bundleno = 1101 (0x44d), region = 52  ;;  %s4789_s23 = sshll.u32 (!%p5400_p5), %s369_s22, 2 }
  0x77   : > { %s368_s13 = scalar_lea.sflag (!%p5400_p5), [#allocation4], %s367_s18  ;;  %s371_s26 = scalar_lea.vmem (!%p5400_p5), [#allocation3], %s4789_s23 }
  0x7b   : > { %4514 = dma.done.wait (%p4718_p12), %s368_s13, 64  }
  0x7c   : > { %4516 = vsyncadd (%p4718_p12), %s368_s13, 4294967232  ;;  %p5401_p13 = scmp.eq.s32.totalorder %s4653_s11, 0 }
  0x7e   : > { %4518 = dma.done.wait (%p5401_p13), [#allocation7], 16448   ;;  %p5402_p0 = pmov %p5401_p13 }
  0x80   : > { %4520 = vsyncadd (%p5402_p0), [#allocation7], 4294950848  ;;  %p5403_p2 = pmov %p5402_p0 }
  0x81   : > { %p5404_p1 = pmov %p5402_p0 }
  0x82   : > { %4522 = dma.done.wait (%p5403_p2), [#allocation10], 64  }
  0x83   : > { %4524 = vsyncadd (%p5404_p1), [#allocation10], 4294967232  ;;  %s3671_s12 = sshll.u32 %s369_s22, 11 }
  0x84   : > { %s4804_s24 = scalar_lea.vmem [#allocation11], %s3671_s12 }
  0x85   : > { %4526 = dma.done.wait (%p4718_p12), %s368_s13, 32768  }
  0x86   : > { %4528 = vsyncadd (%p4718_p12), %s368_s13, 4294934528  ;;  %p5405_p3 = pmov %p5402_p0 }
  0x87   : > { %p5406_p4 = pmov %p5402_p0 }
  0x88   : > { %4530 = dma.done.wait (%p5405_p3), [#allocation7], 128  }
  0x89   : > { %4532 = vsyncadd (%p5406_p4), [#allocation7], 4294967168  ;;  %p5407_p6 = pmov %p5402_p0 }
  0x8a   : > { %p5408_p7 = pmov %p5402_p0 }
  0x8b   : > { %4534 = dma.done.wait (%p5407_p6), [#allocation10], 16  }
  0x8c   : > { %4536 = vsyncadd (%p5408_p7), [#allocation10], 4294967280  ;;  %p3674_p8 = scmp.ne.s32.totalorder %s4555_s30, 0 }
  0x8e   : > { %439 = sbr.rel (%p3674_p8) target bundleno = 149 (0x95), region = 84 }
  0x93   : > { %v4574_v0 = vmov 0.0  }
  0x94   : > { %440 = vst [vmem:[#allocation2] sm:$0xff] %v4574_v0  ;;  %441 = vst [vmem:[#allocation2 + $0x8] sm:$0xff] %v4574_v0 }
  0x95 PF: > { %v504_v1 = vld [vmem:[#allocation6 + $0x1e8] sm:$0xff]  ;;  %v506_v2 = vld [vmem:[#allocation6 + $0x1f8] sm:$0xff]  ;;  %v503_v3 = vld [vmem:[#allocation6 + $0x1e0] sm:$0xff]  ;;  %p3932_p12 = scmp.ne.s32.totalorder %s4555_s30, 3 }
  0x96   : > { %582 = vmatprep.subr.mxu0 %v504_v1  ;;  %653 = vmatprep.subr.mxu1 %v506_v2  ;;  %v505_v4 = vld [vmem:[#allocation6 + $0x1f0] sm:$0xff]  ;;  %v500_v5 = vld [vmem:[#allocation6 + $0x1c8] sm:$0xff]  ;;  %v502_v6 = vld [vmem:[#allocation6 + $0x1d8] sm:$0xff] }
  0x97   : > { %583 = vmatpush1.msra.mxu0 %v503_v3  ;;  %654 = vmatpush1.msra.mxu1 %v505_v4  ;;  %v499_v7 = vld [vmem:[#allocation6 + $0x1c0] sm:$0xff]  ;;  %v501_v8 = vld [vmem:[#allocation6 + $0x1d0] sm:$0xff]  ;;  %v496_v9 = vld [vmem:[#allocation6 + $0x1a8] sm:$0xff] }
  0x98   : > { %584 = vmatprep.subr.mxu0 %v500_v5  ;;  %655 = vmatprep.subr.mxu1 %v502_v6  ;;  %v498_v10 = vld [vmem:[#allocation6 + $0x1b8] sm:$0xff]  ;;  %v495_v11 = vld [vmem:[#allocation6 + $0x1a0] sm:$0xff]  ;;  %v497_v12 = vld [vmem:[#allocation6 + $0x1b0] sm:$0xff] }
  0x99   : > { %585 = vmatpush1.msra.mxu0 %v499_v7  ;;  %656 = vmatpush1.msra.mxu1 %v501_v8  ;;  %v492_v13 = vld [vmem:[#allocation6 + $0x188] sm:$0xff]  ;;  %v494_v14 = vld [vmem:[#allocation6 + $0x198] sm:$0xff]  ;;  %v491_v15 = vld [vmem:[#allocation6 + $0x180] sm:$0xff] }
  0x9a   : > { %586 = vmatprep.subr.mxu0 %v496_v9  ;;  %657 = vmatprep.subr.mxu1 %v498_v10  ;;  %v493_v16 = vld [vmem:[#allocation6 + $0x190] sm:$0xff]  ;;  %v488_v17 = vld [vmem:[#allocation6 + $0x168] sm:$0xff]  ;;  %v490_v18 = vld [vmem:[#allocation6 + $0x178] sm:$0xff] }
  0x9b   : > { %587 = vmatpush1.msra.mxu0 %v495_v11  ;;  %658 = vmatpush1.msra.mxu1 %v497_v12  ;;  %v487_v19 = vld [vmem:[#allocation6 + $0x160] sm:$0xff]  ;;  %v489_v20 = vld [vmem:[#allocation6 + $0x170] sm:$0xff]  ;;  %v484_v21 = vld [vmem:[#allocation6 + $0x148] sm:$0xff] }
  0x9c   : > { %588 = vmatprep.subr.mxu0 %v492_v13  ;;  %659 = vmatprep.subr.mxu1 %v494_v14  ;;  %v486_v22 = vld [vmem:[#allocation6 + $0x158] sm:$0xff]  ;;  %v483_v23 = vld [vmem:[#allocation6 + $0x140] sm:$0xff]  ;;  %v485_v24 = vld [vmem:[#allocation6 + $0x150] sm:$0xff] }
  0x9d   : > { %589 = vmatpush1.msra.mxu0 %v491_v15  ;;  %660 = vmatpush1.msra.mxu1 %v493_v16  ;;  %v480_v25 = vld [vmem:[#allocation6 + $0x128] sm:$0xff]  ;;  %v482_v26 = vld [vmem:[#allocation6 + $0x138] sm:$0xff]  ;;  %v479_v27 = vld [vmem:[#allocation6 + $0x120] sm:$0xff] }
  0x9e   : > { %590 = vmatprep.subr.mxu0 %v488_v17  ;;  %661 = vmatprep.subr.mxu1 %v490_v18  ;;  %v481_v28 = vld [vmem:[#allocation6 + $0x130] sm:$0xff]  ;;  %v476_v29 = vld [vmem:[#allocation6 + $0x108] sm:$0xff]  ;;  %v478_v30 = vld [vmem:[#allocation6 + $0x118] sm:$0xff] }
  0x9f   : > { %591 = vmatpush1.msra.mxu0 %v487_v19  ;;  %662 = vmatpush1.msra.mxu1 %v489_v20  ;;  %v475_v31 = vld [vmem:[#allocation6 + $0x100] sm:$0xff]  ;;  %v477_v32 = vld [vmem:[#allocation6 + $0x110] sm:$0xff]  ;;  %v472_v33 = vld [vmem:[#allocation6 + $0xe8] sm:$0xff] }
  0xa0   : > { %592 = vmatprep.subr.mxu0 %v484_v21  ;;  %663 = vmatprep.subr.mxu1 %v486_v22  ;;  %v474_v34 = vld [vmem:[#allocation6 + $0xf8] sm:$0xff]  ;;  %v471_v35 = vld [vmem:[#allocation6 + $0xe0] sm:$0xff]  ;;  %v473_v36 = vld [vmem:[#allocation6 + $0xf0] sm:$0xff] }
  0xa1   : > { %593 = vmatpush1.msra.mxu0 %v483_v23  ;;  %664 = vmatpush1.msra.mxu1 %v485_v24  ;;  %v468_v37 = vld [vmem:[#allocation6 + $0xc8] sm:$0xff]  ;;  %v470_v38 = vld [vmem:[#allocation6 + $0xd8] sm:$0xff]  ;;  %v467_v39 = vld [vmem:[#allocation6 + $0xc0] sm:$0xff] }
  0xa2   : > { %594 = vmatprep.subr.mxu0 %v480_v25  ;;  %665 = vmatprep.subr.mxu1 %v482_v26  ;;  %v469_v40 = vld [vmem:[#allocation6 + $0xd0] sm:$0xff]  ;;  %v464_v41 = vld [vmem:[#allocation6 + $0xa8] sm:$0xff]  ;;  %v466_v42 = vld [vmem:[#allocation6 + $0xb8] sm:$0xff] }
  0xa3   : > { %595 = vmatpush1.msra.mxu0 %v479_v27  ;;  %666 = vmatpush1.msra.mxu1 %v481_v28  ;;  %v463_v43 = vld [vmem:[#allocation6 + $0xa0] sm:$0xff]  ;;  %v465_v44 = vld [vmem:[#allocation6 + $0xb0] sm:$0xff]  ;;  %v460_v45 = vld [vmem:[#allocation6 + $0x88] sm:$0xff] }
  0xa4   : > { %596 = vmatprep.subr.mxu0 %v476_v29  ;;  %667 = vmatprep.subr.mxu1 %v478_v30  ;;  %v462_v46 = vld [vmem:[#allocation6 + $0x98] sm:$0xff]  ;;  %v459_v47 = vld [vmem:[#allocation6 + $0x80] sm:$0xff]  ;;  %v461_v48 = vld [vmem:[#allocation6 + $0x90] sm:$0xff] }
  0xa5   : > { %597 = vmatpush1.msra.mxu0 %v475_v31  ;;  %668 = vmatpush1.msra.mxu1 %v477_v32  ;;  %v456_v49 = vld [vmem:[#allocation6 + $0x68] sm:$0xff]  ;;  %v458_v50 = vld [vmem:[#allocation6 + $0x78] sm:$0xff]  ;;  %v455_v51 = vld [vmem:[#allocation6 + $0x60] sm:$0xff] }
  0xa6   : > { %598 = vmatprep.subr.mxu0 %v472_v33  ;;  %669 = vmatprep.subr.mxu1 %v474_v34  ;;  %v457_v52 = vld [vmem:[#allocation6 + $0x70] sm:$0xff]  ;;  %v452_v53 = vld [vmem:[#allocation6 + $0x48] sm:$0xff]  ;;  %v454_v54 = vld [vmem:[#allocation6 + $0x58] sm:$0xff] }
  0xa7   : > { %599 = vmatpush1.msra.mxu0 %v471_v35  ;;  %670 = vmatpush1.msra.mxu1 %v473_v36  ;;  %v451_v55 = vld [vmem:[#allocation6 + $0x40] sm:$0xff]  ;;  %v453_v56 = vld [vmem:[#allocation6 + $0x50] sm:$0xff]  ;;  %v448_v57 = vld [vmem:[#allocation6 + $0x28] sm:$0xff] }
  0xa8   : > { %600 = vmatprep.subr.mxu0 %v468_v37  ;;  %671 = vmatprep.subr.mxu1 %v470_v38  ;;  %v450_v58 = vld [vmem:[#allocation6 + $0x38] sm:$0xff]  ;;  %v447_v59 = vld [vmem:[#allocation6 + $0x20] sm:$0xff]  ;;  %v449_v60 = vld [vmem:[#allocation6 + $0x30] sm:$0xff] }
  0xa9   : > { %601 = vmatpush1.msra.mxu0 %v467_v39  ;;  %672 = vmatpush1.msra.mxu1 %v469_v40  ;;  %v444_v61 = vld [vmem:[#allocation6 + $0x8] sm:$0xff]  ;;  %v446_v62 = vld [vmem:[#allocation6 + $0x18] sm:$0xff]  ;;  %v443_v63 = vld [vmem:[#allocation6] sm:$0xff] }
  0xaa   : > { %602 = vmatprep.subr.mxu0 %v464_v41  ;;  %673 = vmatprep.subr.mxu1 %v466_v42  ;;  %v445_v0 = vld [vmem:[#allocation6 + $0x10] sm:$0xff]  ;;  %v568_v1 = vld [vmem:[#allocation6 + $0x3e8] sm:$0xff]  ;;  %v570_v2 = vld [vmem:[#allocation6 + $0x3f8] sm:$0xff] }
  0xab   : > { %603 = vmatpush1.msra.mxu0 %v463_v43  ;;  %674 = vmatpush1.msra.mxu1 %v465_v44  ;;  %v567_v3 = vld [vmem:[#allocation6 + $0x3e0] sm:$0xff]  ;;  %v569_v4 = vld [vmem:[#allocation6 + $0x3f0] sm:$0xff]  ;;  %v564_v5 = vld [vmem:[#allocation6 + $0x3c8] sm:$0xff] }
  0xac   : > { %604 = vmatprep.subr.mxu0 %v460_v45  ;;  %675 = vmatprep.subr.mxu1 %v462_v46  ;;  %v566_v6 = vld [vmem:[#allocation6 + $0x3d8] sm:$0xff]  ;;  %v563_v7 = vld [vmem:[#allocation6 + $0x3c0] sm:$0xff]  ;;  %v565_v8 = vld [vmem:[#allocation6 + $0x3d0] sm:$0xff] }
  0xad   : > { %605 = vmatpush1.msra.mxu0 %v459_v47  ;;  %676 = vmatpush1.msra.mxu1 %v461_v48  ;;  %v560_v9 = vld [vmem:[#allocation6 + $0x3a8] sm:$0xff]  ;;  %v562_v10 = vld [vmem:[#allocation6 + $0x3b8] sm:$0xff]  ;;  %v559_v11 = vld [vmem:[#allocation6 + $0x3a0] sm:$0xff] }
  0xae   : > { %606 = vmatprep.subr.mxu0 %v456_v49  ;;  %677 = vmatprep.subr.mxu1 %v458_v50  ;;  %v561_v12 = vld [vmem:[#allocation6 + $0x3b0] sm:$0xff]  ;;  %v556_v13 = vld [vmem:[#allocation6 + $0x388] sm:$0xff]  ;;  %v558_v14 = vld [vmem:[#allocation6 + $0x398] sm:$0xff] }
  0xaf   : > { %607 = vmatpush1.msra.mxu0 %v455_v51  ;;  %678 = vmatpush1.msra.mxu1 %v457_v52  ;;  %v555_v15 = vld [vmem:[#allocation6 + $0x380] sm:$0xff]  ;;  %v557_v16 = vld [vmem:[#allocation6 + $0x390] sm:$0xff]  ;;  %v552_v17 = vld [vmem:[#allocation6 + $0x368] sm:$0xff] }
  0xb0   : > { %608 = vmatprep.subr.mxu0 %v452_v53  ;;  %679 = vmatprep.subr.mxu1 %v454_v54  ;;  %v554_v18 = vld [vmem:[#allocation6 + $0x378] sm:$0xff]  ;;  %v551_v19 = vld [vmem:[#allocation6 + $0x360] sm:$0xff]  ;;  %v553_v20 = vld [vmem:[#allocation6 + $0x370] sm:$0xff] }
  0xb1   : > { %609 = vmatpush1.msra.mxu0 %v451_v55  ;;  %680 = vmatpush1.msra.mxu1 %v453_v56  ;;  %v548_v21 = vld [vmem:[#allocation6 + $0x348] sm:$0xff]  ;;  %v550_v22 = vld [vmem:[#allocation6 + $0x358] sm:$0xff]  ;;  %v547_v23 = vld [vmem:[#allocation6 + $0x340] sm:$0xff] }
  0xb2   : > { %610 = vmatprep.subr.mxu0 %v448_v57  ;;  %681 = vmatprep.subr.mxu1 %v450_v58  ;;  %v549_v24 = vld [vmem:[#allocation6 + $0x350] sm:$0xff]  ;;  %v544_v25 = vld [vmem:[#allocation6 + $0x328] sm:$0xff]  ;;  %v546_v26 = vld [vmem:[#allocation6 + $0x338] sm:$0xff] }
  0xb3   : > { %611 = vmatpush1.msra.mxu0 %v447_v59  ;;  %682 = vmatpush1.msra.mxu1 %v449_v60  ;;  %v543_v27 = vld [vmem:[#allocation6 + $0x320] sm:$0xff]  ;;  %v545_v28 = vld [vmem:[#allocation6 + $0x330] sm:$0xff]  ;;  %v540_v29 = vld [vmem:[#allocation6 + $0x308] sm:$0xff] }
  0xb4   : > { %612 = vmatprep.subr.mxu0 %v444_v61  ;;  %683 = vmatprep.subr.mxu1 %v446_v62  ;;  %v542_v30 = vld [vmem:[#allocation6 + $0x318] sm:$0xff]  ;;  %v539_v31 = vld [vmem:[#allocation6 + $0x300] sm:$0xff]  ;;  %v541_v32 = vld [vmem:[#allocation6 + $0x310] sm:$0xff] }
  0xb5   : > { %613 = vmatpush1.msra.mxu0 %v443_v63  ;;  %684 = vmatpush1.msra.mxu1 %v445_v0  ;;  %v536_v33 = vld [vmem:[#allocation6 + $0x2e8] sm:$0xff]  ;;  %v538_v34 = vld [vmem:[#allocation6 + $0x2f8] sm:$0xff]  ;;  %v535_v35 = vld [vmem:[#allocation6 + $0x2e0] sm:$0xff] }
  0xb6   : > { %614 = vmatprep.subr.mxu0 %v568_v1  ;;  %685 = vmatprep.subr.mxu1 %v570_v2  ;;  %v537_v36 = vld [vmem:[#allocation6 + $0x2f0] sm:$0xff]  ;;  %v532_v37 = vld [vmem:[#allocation6 + $0x2c8] sm:$0xff]  ;;  %v534_v38 = vld [vmem:[#allocation6 + $0x2d8] sm:$0xff] }
  0xb7   : > { %615 = vmatpush2.msra.mxu0 %v567_v3  ;;  %686 = vmatpush2.msra.mxu1 %v569_v4  ;;  %v531_v39 = vld [vmem:[#allocation6 + $0x2c0] sm:$0xff]  ;;  %v533_v40 = vld [vmem:[#allocation6 + $0x2d0] sm:$0xff]  ;;  %v528_v41 = vld [vmem:[#allocation6 + $0x2a8] sm:$0xff] }
  0xb8   : > { %616 = vmatprep.subr.mxu0 %v564_v5  ;;  %687 = vmatprep.subr.mxu1 %v566_v6  ;;  %v530_v42 = vld [vmem:[#allocation6 + $0x2b8] sm:$0xff]  ;;  %v527_v43 = vld [vmem:[#allocation6 + $0x2a0] sm:$0xff]  ;;  %v529_v44 = vld [vmem:[#allocation6 + $0x2b0] sm:$0xff] }
  0xb9   : > { %617 = vmatpush2.msra.mxu0 %v563_v7  ;;  %688 = vmatpush2.msra.mxu1 %v565_v8  ;;  %v524_v45 = vld [vmem:[#allocation6 + $0x288] sm:$0xff]  ;;  %v526_v46 = vld [vmem:[#allocation6 + $0x298] sm:$0xff]  ;;  %v523_v47 = vld [vmem:[#allocation6 + $0x280] sm:$0xff] }
  0xba   : > { %618 = vmatprep.subr.mxu0 %v560_v9  ;;  %689 = vmatprep.subr.mxu1 %v562_v10  ;;  %v525_v48 = vld [vmem:[#allocation6 + $0x290] sm:$0xff]  ;;  %v520_v49 = vld [vmem:[#allocation6 + $0x268] sm:$0xff]  ;;  %v522_v50 = vld [vmem:[#allocation6 + $0x278] sm:$0xff] }
  0xbb   : > { %619 = vmatpush2.msra.mxu0 %v559_v11  ;;  %690 = vmatpush2.msra.mxu1 %v561_v12  ;;  %v519_v51 = vld [vmem:[#allocation6 + $0x260] sm:$0xff]  ;;  %v521_v52 = vld [vmem:[#allocation6 + $0x270] sm:$0xff]  ;;  %v516_v53 = vld [vmem:[#allocation6 + $0x248] sm:$0xff] }
  0xbc   : > { %620 = vmatprep.subr.mxu0 %v556_v13  ;;  %691 = vmatprep.subr.mxu1 %v558_v14  ;;  %v518_v54 = vld [vmem:[#allocation6 + $0x258] sm:$0xff]  ;;  %v515_v55 = vld [vmem:[#allocation6 + $0x240] sm:$0xff]  ;;  %v517_v56 = vld [vmem:[#allocation6 + $0x250] sm:$0xff] }
  0xbd   : > { %621 = vmatpush2.msra.mxu0 %v555_v15  ;;  %692 = vmatpush2.msra.mxu1 %v557_v16  ;;  %v512_v57 = vld [vmem:[#allocation6 + $0x228] sm:$0xff]  ;;  %v3675_v58 = vld.sshfl [vmem:[%s371_s26] sm:$0x33 pattern:$0x76325410]  ;;  %v511_v60 = vld [vmem:[#allocation6 + $0x220] sm:$0xff] }
  0xbe   : > { %622 = vmatprep.subr.mxu0 %v552_v17  ;;  %693 = vmatprep.subr.mxu1 %v554_v18  ;;  %v514_v59 = vld [vmem:[#allocation6 + $0x238] sm:$0xff]  ;;  %v513_v61 = vld [vmem:[#allocation6 + $0x230] sm:$0xff]  ;;  %v508_v62 = vld [vmem:[#allocation6 + $0x208] sm:$0xff]  ;;  %v579_v1 = vcombine.high %v3675_v58, %v3675_v58 }
  0xbf   : > { %623 = vmatpush2.msra.mxu0 %v551_v19  ;;  %694 = vmatpush2.msra.mxu1 %v553_v20  ;;  %v510_v63 = vld [vmem:[#allocation6 + $0x218] sm:$0xff]  ;;  %v842_v0 = vld [vmem:[%s4804_s24 + $0x1c0] sm:$0xff]  ;;  %v507_v5 = vld [vmem:[#allocation6 + $0x200] sm:$0xff] }
  0xc0   : > { %624 = vmatprep.subr.mxu0 %v548_v21  ;;  %695 = vmatprep.subr.mxu1 %v550_v22  ;;  %v846_v2 = vld [vmem:[%s4804_s24 + $0x1e0] sm:$0xff]  ;;  %v509_v6 = vld [vmem:[#allocation6 + $0x210] sm:$0xff] }
  0xc1   : > { %625 = vmatpush2.msra.mxu0 %v547_v23  ;;  %696 = vmatpush2.msra.mxu1 %v549_v24  ;;  %v970_v3 = vld [vmem:[%s4804_s24 + $0x5c0] sm:$0xff]  ;;  %v3733_v11 = vcombine.high %v842_v0, %v846_v2  ;;  %v3732_v13 = vcombine.low %v842_v0, %v846_v2 }
  0xc2   : > { %626 = vmatprep.subr.mxu0 %v544_v25  ;;  %697 = vmatprep.subr.mxu1 %v546_v26  ;;  %v974_v4 = vld [vmem:[%s4804_s24 + $0x5e0] sm:$0xff] }
  0xc3   : > { %627 = vmatpush2.msra.mxu0 %v543_v27  ;;  %698 = vmatpush2.msra.mxu1 %v545_v28  ;;  %v834_v7 = vld [vmem:[%s4804_s24 + $0x180] sm:$0xff]  ;;  %v3861_v12 = vcombine.high %v970_v3, %v974_v4  ;;  %v3860_v14 = vcombine.low %v970_v3, %v974_v4 }
  0xc4   : > { %628 = vmatprep.subr.mxu0 %v540_v29  ;;  %699 = vmatprep.subr.mxu1 %v542_v30  ;;  %v838_v8 = vld [vmem:[%s4804_s24 + $0x1a0] sm:$0xff] }
  0xc5   : > { %629 = vmatpush2.msra.mxu0 %v539_v31  ;;  %700 = vmatpush2.msra.mxu1 %v541_v32  ;;  %v962_v9 = vld [vmem:[%s4804_s24 + $0x580] sm:$0xff]  ;;  %v3725_v15 = vcombine.high %v834_v7, %v838_v8  ;;  %v3724_v21 = vcombine.low %v834_v7, %v838_v8 }
  0xc6   : > { %630 = vmatprep.subr.mxu0 %v536_v33  ;;  %701 = vmatprep.subr.mxu1 %v538_v34  ;;  %v966_v10 = vld [vmem:[%s4804_s24 + $0x5a0] sm:$0xff] }
  0xc7   : > { %631 = vmatpush2.msra.mxu0 %v535_v35  ;;  %702 = vmatpush2.msra.mxu1 %v537_v36  ;;  %v3853_v16 = vcombine.high %v962_v9, %v966_v10  ;;  %v826_v17 = vld [vmem:[%s4804_s24 + $0x140] sm:$0xff]  ;;  %v3852_v22 = vcombine.low %v962_v9, %v966_v10 }
  0xc8   : > { %632 = vmatprep.subr.mxu0 %v532_v37  ;;  %703 = vmatprep.subr.mxu1 %v534_v38  ;;  %v830_v18 = vld [vmem:[%s4804_s24 + $0x160] sm:$0xff] }
  0xc9   : > { %633 = vmatpush2.msra.mxu0 %v531_v39  ;;  %704 = vmatpush2.msra.mxu1 %v533_v40  ;;  %v954_v19 = vld [vmem:[%s4804_s24 + $0x540] sm:$0xff]  ;;  %v3717_v23 = vcombine.high %v826_v17, %v830_v18  ;;  %v3716_v29 = vcombine.low %v826_v17, %v830_v18 }
  0xca   : > { %634 = vmatprep.subr.mxu0 %v528_v41  ;;  %705 = vmatprep.subr.mxu1 %v530_v42  ;;  %v958_v20 = vld [vmem:[%s4804_s24 + $0x560] sm:$0xff] }
  0xcb   : > { %635 = vmatpush2.msra.mxu0 %v527_v43  ;;  %706 = vmatpush2.msra.mxu1 %v529_v44  ;;  %v3845_v24 = vcombine.high %v954_v19, %v958_v20  ;;  %v818_v25 = vld [vmem:[%s4804_s24 + $0x100] sm:$0xff]  ;;  %v3844_v30 = vcombine.low %v954_v19, %v958_v20 }
  0xcc   : > { %636 = vmatprep.subr.mxu0 %v524_v45  ;;  %707 = vmatprep.subr.mxu1 %v526_v46  ;;  %v822_v26 = vld [vmem:[%s4804_s24 + $0x120] sm:$0xff] }
  0xcd   : > { %637 = vmatpush2.msra.mxu0 %v523_v47  ;;  %708 = vmatpush2.msra.mxu1 %v525_v48  ;;  %v946_v27 = vld [vmem:[%s4804_s24 + $0x500] sm:$0xff]  ;;  %v3709_v31 = vcombine.high %v818_v25, %v822_v26  ;;  %v3708_v37 = vcombine.low %v818_v25, %v822_v26 }
  0xce   : > { %638 = vmatprep.subr.mxu0 %v520_v49  ;;  %709 = vmatprep.subr.mxu1 %v522_v50  ;;  %v950_v28 = vld [vmem:[%s4804_s24 + $0x520] sm:$0xff] }
  0xcf   : > { %639 = vmatpush2.msra.mxu0 %v519_v51  ;;  %710 = vmatpush2.msra.mxu1 %v521_v52  ;;  %v3837_v32 = vcombine.high %v946_v27, %v950_v28  ;;  %v810_v33 = vld [vmem:[%s4804_s24 + $0xc0] sm:$0xff]  ;;  %v3836_v38 = vcombine.low %v946_v27, %v950_v28 }
  0xd0   : > { %640 = vmatprep.subr.mxu0 %v516_v53  ;;  %711 = vmatprep.subr.mxu1 %v518_v54  ;;  %v814_v34 = vld [vmem:[%s4804_s24 + $0xe0] sm:$0xff] }
  0xd1   : > { %641 = vmatpush2.msra.mxu0 %v515_v55  ;;  %712 = vmatpush2.msra.mxu1 %v517_v56  ;;  %v938_v35 = vld [vmem:[%s4804_s24 + $0x4c0] sm:$0xff]  ;;  %v3701_v39 = vcombine.high %v810_v33, %v814_v34  ;;  %v3700_v45 = vcombine.low %v810_v33, %v814_v34 }
  0xd2   : > { %642 = vmatprep.subr.mxu0 %v512_v57  ;;  %713 = vmatprep.subr.mxu1 %v514_v59  ;;  %v942_v36 = vld [vmem:[%s4804_s24 + $0x4e0] sm:$0xff] }
  0xd3   : > { %643 = vmatpush2.msra.mxu0 %v511_v60  ;;  %714 = vmatpush2.msra.mxu1 %v513_v61  ;;  %v3829_v40 = vcombine.high %v938_v35, %v942_v36  ;;  %v802_v41 = vld [vmem:[%s4804_s24 + $0x80] sm:$0xff]  ;;  %v3828_v46 = vcombine.low %v938_v35, %v942_v36 }
  0xd4   : > { %644 = vmatprep.subr.mxu0 %v508_v62  ;;  %715 = vmatprep.subr.mxu1 %v510_v63  ;;  %v806_v42 = vld [vmem:[%s4804_s24 + $0xa0] sm:$0xff] }
  0xd5   : > { %645 = vmatpush2.msra.mxu0 %v507_v5  ;;  %646 = vmatprep.mubr.f32.mxu0 %v579_v1  ;;  %v930_v43 = vld [vmem:[%s4804_s24 + $0x480] sm:$0xff]  ;;  %v3693_v47 = vcombine.high %v802_v41, %v806_v42  ;;  %v3692_v53 = vcombine.low %v802_v41, %v806_v42 }
  0xd6   : > { %716 = vmatpush2.msra.mxu1 %v509_v6  ;;  %717 = vmatprep.mubr.f32.mxu1 %v579_v1  ;;  %v934_v44 = vld [vmem:[%s4804_s24 + $0x4a0] sm:$0xff] }
  0xd7   : > { %647 = vmatmul.mubr.f32.vlgmr.msra.gmra.mxu0 %v3675_v58  ;;  %718 = vmatmul.mubr.f32.vlgmr.msra.gmra.mxu1 %v3675_v58  ;;  %v3821_v48 = vcombine.high %v930_v43, %v934_v44  ;;  %v794_v49 = vld [vmem:[%s4804_s24 + $0x40] sm:$0xff]  ;;  %v3820_v54 = vcombine.low %v930_v43, %v934_v44 }
  0xd8   : > { %2322 = vmatprep.subr.bf16.mxu0 %v3733_v11  ;;  %2363 = vmatprep.subr.bf16.mxu1 %v3861_v12  ;;  %v798_v50 = vld [vmem:[%s4804_s24 + $0x60] sm:$0xff] }
  0xd9   : > { %2323 = vmatpush1.bf16.msra.mxu0 %v3732_v13  ;;  %2364 = vmatpush1.bf16.msra.mxu1 %v3860_v14  ;;  %v922_v51 = vld [vmem:[%s4804_s24 + $0x440] sm:$0xff]  ;;  %v3685_v55 = vcombine.high %v794_v49, %v798_v50  ;;  %v3684_v61 = vcombine.low %v794_v49, %v798_v50 }
  0xda   : > { %2324 = vmatprep.subr.bf16.mxu0 %v3725_v15  ;;  %2365 = vmatprep.subr.bf16.mxu1 %v3853_v16  ;;  %v926_v52 = vld [vmem:[%s4804_s24 + $0x460] sm:$0xff] }
  0xdb   : > { %v3813_v56 = vcombine.high %v922_v51, %v926_v52  ;;  %v786_v57 = vld [vmem:[%s4804_s24] sm:$0xff]  ;;  %v3812_v62 = vcombine.low %v922_v51, %v926_v52 }
  0xdc   : > { %v790_v58 = vld [vmem:[%s4804_s24 + $0x20] sm:$0xff] }
  0xdd   : > { %2325 = vmatpush1.bf16.msra.mxu0 %v3724_v21  ;;  %2366 = vmatpush1.bf16.msra.mxu1 %v3852_v22  ;;  %v914_v59 = vld [vmem:[%s4804_s24 + $0x400] sm:$0xff]  ;;  %v3677_v63 = vcombine.high %v786_v57, %v790_v58  ;;  %v3676_v5 = vcombine.low %v786_v57, %v790_v58 }
  0xde   : > { %2326 = vmatprep.subr.bf16.mxu0 %v3717_v23  ;;  %2367 = vmatprep.subr.bf16.mxu1 %v3845_v24  ;;  %v918_v60 = vld [vmem:[%s4804_s24 + $0x420] sm:$0xff] }
  0xdf   : > { %v3805_v0 = vcombine.high %v914_v59, %v918_v60  ;;  %v906_v1 = vld [vmem:[%s4804_s24 + $0x3c0] sm:$0xff]  ;;  %v3804_v6 = vcombine.low %v914_v59, %v918_v60 }
  0xe0   : > { %v910_v2 = vld [vmem:[%s4804_s24 + $0x3e0] sm:$0xff] }
  0xe1   : > { %2327 = vmatpush1.bf16.msra.mxu0 %v3716_v29  ;;  %2368 = vmatpush1.bf16.msra.mxu1 %v3844_v30  ;;  %v1034_v3 = vld [vmem:[%s4804_s24 + $0x7c0] sm:$0xff]  ;;  %v3797_v7 = vcombine.high %v906_v1, %v910_v2  ;;  %v3796_v13 = vcombine.low %v906_v1, %v910_v2 }
  0xe2   : > { %2328 = vmatprep.subr.bf16.mxu0 %v3709_v31  ;;  %2369 = vmatprep.subr.bf16.mxu1 %v3837_v32  ;;  %v1038_v4 = vld [vmem:[%s4804_s24 + $0x7e0] sm:$0xff] }
  0xe3   : > { %v3925_v8 = vcombine.high %v1034_v3, %v1038_v4  ;;  %v898_v9 = vld [vmem:[%s4804_s24 + $0x380] sm:$0xff]  ;;  %v3924_v14 = vcombine.low %v1034_v3, %v1038_v4  ;;  %v843_v3 = vld [vmem:[%s4804_s24 + $0x1c8] sm:$0xff] }
  0xe4   : > { %v902_v10 = vld [vmem:[%s4804_s24 + $0x3a0] sm:$0xff]  ;;  %v847_v4 = vld [vmem:[%s4804_s24 + $0x1e8] sm:$0xff] }
  0xe5   : > { %2329 = vmatpush1.bf16.msra.mxu0 %v3708_v37  ;;  %2370 = vmatpush1.bf16.msra.mxu1 %v3836_v38  ;;  %v1026_v11 = vld [vmem:[%s4804_s24 + $0x780] sm:$0xff]  ;;  %v3789_v15 = vcombine.high %v898_v9, %v902_v10  ;;  %v3788_v21 = vcombine.low %v898_v9, %v902_v10 }
  0xe6   : > { %2330 = vmatprep.subr.bf16.mxu0 %v3701_v39  ;;  %2371 = vmatprep.subr.bf16.mxu1 %v3829_v40  ;;  %v1030_v12 = vld [vmem:[%s4804_s24 + $0x7a0] sm:$0xff] }
  0xe7   : > { %v3917_v16 = vcombine.high %v1026_v11, %v1030_v12  ;;  %v890_v17 = vld [vmem:[%s4804_s24 + $0x340] sm:$0xff]  ;;  %v3916_v22 = vcombine.low %v1026_v11, %v1030_v12  ;;  %v726_v11 = vlaneseq }
  0xe8   : > { %v894_v18 = vld [vmem:[%s4804_s24 + $0x360] sm:$0xff] }
  0xe9   : > { %2331 = vmatpush1.bf16.msra.mxu0 %v3700_v45  ;;  %2372 = vmatpush1.bf16.msra.mxu1 %v3828_v46  ;;  %v1018_v19 = vld [vmem:[%s4804_s24 + $0x740] sm:$0xff]  ;;  %v3781_v23 = vcombine.high %v890_v17, %v894_v18  ;;  %v3780_v29 = vcombine.low %v890_v17, %v894_v18  ;;  %v4889_v12 = vshrl.u32 %v726_v11, 7  ;;  %v750_v18 = vld [vmem:[#allocation9] sm:$0xf] }
  0xea   : > { %2332 = vmatprep.subr.bf16.mxu0 %v3693_v47  ;;  %2373 = vmatprep.subr.bf16.mxu1 %v3821_v48  ;;  %v1022_v20 = vld [vmem:[%s4804_s24 + $0x760] sm:$0xff] }
  0xeb   : > { %v3909_v24 = vcombine.high %v1018_v19, %v1022_v20  ;;  %v882_v25 = vld [vmem:[%s4804_s24 + $0x300] sm:$0xff]  ;;  %v3908_v30 = vcombine.low %v1018_v19, %v1022_v20  ;;  %v4901_v17 = vsub.s32 3, %v4889_v12 }
  0xec   : > { %v886_v26 = vld [vmem:[%s4804_s24 + $0x320] sm:$0xff] }
  0xed   : > { %2333 = vmatpush1.bf16.msra.mxu0 %v3692_v53  ;;  %2374 = vmatpush1.bf16.msra.mxu1 %v3820_v54  ;;  %v1010_v27 = vld [vmem:[%s4804_s24 + $0x700] sm:$0xff]  ;;  %v3773_v31 = vcombine.high %v882_v25, %v886_v26  ;;  %v3772_v37 = vcombine.low %v882_v25, %v886_v26 }
  0xee   : > { %2334 = vmatprep.subr.bf16.mxu0 %v3685_v55  ;;  %2375 = vmatprep.subr.bf16.mxu1 %v3813_v56  ;;  %v1014_v28 = vld [vmem:[%s4804_s24 + $0x720] sm:$0xff] }
  0xef   : > { %v3901_v32 = vcombine.high %v1010_v27, %v1014_v28  ;;  %v874_v33 = vld [vmem:[%s4804_s24 + $0x2c0] sm:$0xff]  ;;  %v3900_v38 = vcombine.low %v1010_v27, %v1014_v28 }
  0xf0   : > { %v878_v34 = vld [vmem:[%s4804_s24 + $0x2e0] sm:$0xff] }
  0xf1   : > { %2335 = vmatpush1.bf16.msra.mxu0 %v3684_v61  ;;  %2376 = vmatpush1.bf16.msra.mxu1 %v3812_v62  ;;  %v1002_v35 = vld [vmem:[%s4804_s24 + $0x6c0] sm:$0xff]  ;;  %v3765_v39 = vcombine.high %v874_v33, %v878_v34  ;;  %v3764_v45 = vcombine.low %v874_v33, %v878_v34 }
  0xf2   : > { %2336 = vmatprep.subr.bf16.mxu0 %v3677_v63  ;;  %2377 = vmatprep.subr.bf16.mxu1 %v3805_v0  ;;  %v1006_v36 = vld [vmem:[%s4804_s24 + $0x6e0] sm:$0xff] }
  0xf3   : > { %v3893_v40 = vcombine.high %v1002_v35, %v1006_v36  ;;  %v866_v41 = vld [vmem:[%s4804_s24 + $0x280] sm:$0xff]  ;;  %v3892_v46 = vcombine.low %v1002_v35, %v1006_v36 }
  0xf4   : > { %v870_v42 = vld [vmem:[%s4804_s24 + $0x2a0] sm:$0xff] }
  0xf5   : > { %2337 = vmatpush1.bf16.msra.mxu0 %v3676_v5  ;;  %2378 = vmatpush1.bf16.msra.mxu1 %v3804_v6  ;;  %v994_v43 = vld [vmem:[%s4804_s24 + $0x680] sm:$0xff]  ;;  %v3757_v47 = vcombine.high %v866_v41, %v870_v42  ;;  %v3756_v49 = vcombine.low %v866_v41, %v870_v42  ;;  %v971_v5 = vld [vmem:[%s4804_s24 + $0x5c8] sm:$0xff]  ;;  %v3735_v6 = vcombine.high %v843_v3, %v847_v4 }
  0xf6   : > { %2338 = vmatprep.subr.bf16.mxu0 %v3797_v7  ;;  %2379 = vmatprep.subr.bf16.mxu1 %v3925_v8  ;;  %v998_v44 = vld [vmem:[%s4804_s24 + $0x6a0] sm:$0xff]  ;;  %v975_v7 = vld [vmem:[%s4804_s24 + $0x5e8] sm:$0xff]  ;;  %v3734_v8 = vcombine.low %v843_v3, %v847_v4 }
  0xf7   : > { %v3885_v48 = vcombine.high %v994_v43, %v998_v44  ;;  %v3884_v50 = vcombine.low %v994_v43, %v998_v44  ;;  %v858_v51 = vld [vmem:[%s4804_s24 + $0x240] sm:$0xff]  ;;  %v3862_v9 = vcombine.low %v971_v5, %v975_v7  ;;  %v3863_v10 = vcombine.high %v971_v5, %v975_v7  ;;  %v835_v43 = vld [vmem:[%s4804_s24 + $0x188] sm:$0xff] }
  0xf8   : > { %v862_v52 = vld [vmem:[%s4804_s24 + $0x260] sm:$0xff]  ;;  %v839_v44 = vld [vmem:[%s4804_s24 + $0x1a8] sm:$0xff] }
  0xf9   : > { %2339 = vmatpush2.bf16.msra.mxu0 %v3796_v13  ;;  %2380 = vmatpush2.bf16.msra.mxu1 %v3924_v14  ;;  %v986_v53 = vld [vmem:[%s4804_s24 + $0x640] sm:$0xff]  ;;  %v3748_v55 = vcombine.low %v858_v51, %v862_v52  ;;  %v3749_v56 = vcombine.high %v858_v51, %v862_v52  ;;  %v4892_v13 = vsub.s32 0, %v4889_v12  ;;  %v4895_v14 = vsub.s32 2, %v4889_v12  ;;  %v827_v51 = vld [vmem:[%s4804_s24 + $0x148] sm:$0xff] }
  0xfa   : > { %2340 = vmatprep.subr.bf16.mxu0 %v3789_v15  ;;  %2381 = vmatprep.subr.bf16.mxu1 %v3917_v16  ;;  %v990_v54 = vld [vmem:[%s4804_s24 + $0x660] sm:$0xff]  ;;  %v724_v15 = vld [vmem:[#allocation8] sm:$0xf]  ;;  %v4898_v16 = vsub.s32 1, %v4889_v12  ;;  %v3727_v52 = vcombine.high %v835_v43, %v839_v44  ;;  %v811_v5 = vld [vmem:[%s4804_s24 + $0xc8] sm:$0xff] }
  0xfb   : > { %v3876_v57 = vcombine.low %v986_v53, %v990_v54  ;;  %v3877_v58 = vcombine.high %v986_v53, %v990_v54  ;;  %v850_v59 = vld [vmem:[%s4804_s24 + $0x200] sm:$0xff]  ;;  %v729_v19 = vrot.slane %v724_v15, %v4892_v13  ;;  %v737_v20 = vrot.slane %v724_v15, %v4895_v14  ;;  %v831_v54 = vld [vmem:[%s4804_s24 + $0x168] sm:$0xff] }
  0xfc   : > { %v854_v60 = vld [vmem:[%s4804_s24 + $0x220] sm:$0xff]  ;;  %v939_v7 = vld [vmem:[%s4804_s24 + $0x4c8] sm:$0xff] }
  0xfd   : > { %2341 = vmatpush2.bf16.msra.mxu0 %v3788_v21  ;;  %2382 = vmatpush2.bf16.msra.mxu1 %v3916_v22  ;;  %v978_v61 = vld [vmem:[%s4804_s24 + $0x600] sm:$0xff]  ;;  %v3741_v62 = vcombine.high %v850_v59, %v854_v60  ;;  %v3740_v0 = vcombine.low %v850_v59, %v854_v60  ;;  %v755_v21 = vrot.slane %v750_v18, %v4892_v13 }
  0xfe   : > { %2342 = vmatprep.subr.bf16.mxu0 %v3781_v23  ;;  %2383 = vmatprep.subr.bf16.mxu1 %v3909_v24  ;;  %v982_v63 = vld [vmem:[%s4804_s24 + $0x620] sm:$0xff]  ;;  %v763_v22 = vrot.slane %v750_v18, %v4895_v14  ;;  %v733_v23 = vrot.slane %v724_v15, %v4898_v16  ;;  %v741_v24 = vrot.slane %v724_v15, %v4901_v17 }
  0xff   : > { %v3868_v1 = vcombine.low %v978_v61, %v982_v63  ;;  %v3869_v2 = vcombine.high %v978_v61, %v982_v63  ;;  %v3719_v59 = vcombine.high %v827_v51, %v831_v54  ;;  %v819_v61 = vld [vmem:[%s4804_s24 + $0x108] sm:$0xff] }
 0x100   : > { %v947_v63 = vld [vmem:[%s4804_s24 + $0x508] sm:$0xff] }
 0x101   : > { %2343 = vmatpush2.bf16.msra.mxu0 %v3780_v29  ;;  %2384 = vmatpush2.bf16.msra.mxu1 %v3908_v30  ;;  %v759_v29 = vrot.slane %v750_v18, %v4898_v16  ;;  %v767_v30 = vrot.slane %v750_v18, %v4901_v17  ;;  %v803_v18 = vld [vmem:[%s4804_s24 + $0x88] sm:$0xff] }
 0x102   : > { %2344 = vmatprep.subr.bf16.mxu0 %v3773_v31  ;;  %2385 = vmatprep.subr.bf16.mxu1 %v3901_v32 }
 0x105   : > { %2345 = vmatpush2.bf16.msra.mxu0 %v3772_v37  ;;  %2386 = vmatpush2.bf16.msra.mxu1 %v3900_v38 }
 0x106   : > { %2346 = vmatprep.subr.bf16.mxu0 %v3765_v39  ;;  %2387 = vmatprep.subr.bf16.mxu1 %v3893_v40 }
 0x109   : > { %2347 = vmatpush2.bf16.msra.mxu0 %v3764_v45  ;;  %2388 = vmatpush2.bf16.msra.mxu1 %v3892_v46  ;;  %v963_v45 = vld [vmem:[%s4804_s24 + $0x588] sm:$0xff] }
 0x10a   : > { %2348 = vmatprep.subr.bf16.mxu0 %v3757_v47  ;;  %2389 = vmatprep.subr.bf16.mxu1 %v3885_v48  ;;  %v967_v46 = vld [vmem:[%s4804_s24 + $0x5a8] sm:$0xff] }
 0x10b   : > { %v3855_v53 = vcombine.high %v963_v45, %v967_v46 }
 0x10d   : > { %2349 = vmatpush2.bf16.msra.mxu0 %v3756_v49  ;;  %2390 = vmatpush2.bf16.msra.mxu1 %v3884_v50 }
 0x10e   : > { %2350 = vmatprep.subr.bf16.mxu0 %v3749_v56  ;;  %2391 = vmatprep.subr.bf16.mxu1 %v3877_v58  ;;  %v959_v56 = vld [vmem:[%s4804_s24 + $0x568] sm:$0xff]  ;;  %v3854_v58 = vcombine.low %v963_v45, %v967_v46 }
 0x10f   : > { %v1039_v45 = vld [vmem:[%s4804_s24 + $0x7e8] sm:$0xff] }
 0x111   : > { %2351 = vmatpush2.bf16.msra.mxu0 %v3748_v55  ;;  %2392 = vmatpush2.bf16.msra.mxu1 %v3876_v57  ;;  %v955_v55 = vld [vmem:[%s4804_s24 + $0x548] sm:$0xff]  ;;  %v3726_v57 = vcombine.low %v835_v43, %v839_v44 }
 0x112   : > { %2352 = vmatprep.subr.bf16.mxu0 %v3741_v62  ;;  %2393 = vmatprep.subr.bf16.mxu1 %v3869_v2  ;;  %v3847_v60 = vcombine.high %v955_v55, %v959_v56  ;;  %v823_v62 = vld [vmem:[%s4804_s24 + $0x128] sm:$0xff]  ;;  %v3846_v2 = vcombine.low %v955_v55, %v959_v56 }
 0x113   : > { %v3711_v3 = vcombine.high %v819_v61, %v823_v62  ;;  %v911_v43 = vld [vmem:[%s4804_s24 + $0x3e8] sm:$0xff] }
 0x114   : > { %v1035_v44 = vld [vmem:[%s4804_s24 + $0x7c8] sm:$0xff] }
 0x115   : > { %2353 = vmatpush2.bf16.msra.mxu0 %v3740_v0  ;;  %2394 = vmatpush2.bf16.msra.mxu1 %v3868_v1  ;;  %v951_v0 = vld [vmem:[%s4804_s24 + $0x528] sm:$0xff]  ;;  %v3718_v1 = vcombine.low %v827_v51, %v831_v54 }
 0x116   : > { %2404 = vmatprep.subr.bf16.mxu0 %v3735_v6  ;;  %2445 = vmatprep.subr.bf16.mxu1 %v3863_v10  ;;  %v3839_v4 = vcombine.high %v947_v63, %v951_v0  ;;  %v815_v6 = vld [vmem:[%s4804_s24 + $0xe8] sm:$0xff]  ;;  %v3838_v10 = vcombine.low %v947_v63, %v951_v0 }
 0x117   : > { %v3703_v11 = vcombine.high %v811_v5, %v815_v6  ;;  %v899_v54 = vld [vmem:[%s4804_s24 + $0x388] sm:$0xff] }
 0x118   : > { %v903_v55 = vld [vmem:[%s4804_s24 + $0x3a8] sm:$0xff] }
 0x119   : > { %v1027_v56 = vld [vmem:[%s4804_s24 + $0x788] sm:$0xff] }
 0x11a   : > { %v895_v63 = vld [vmem:[%s4804_s24 + $0x368] sm:$0xff] }
 0x11b   : > { %v1019_v0 = vld [vmem:[%s4804_s24 + $0x748] sm:$0xff] }
 0x197   : > { %v648_v25 = vpop.f32.mrf.mxu0  ;;  %v719_v26 = vpop.f32.mrf.mxu1 }
 0x198   : > { %v746_v27 = vmul.f32 %v729_v19, %v648_v25  ;;  %v748_v28 = vmul.f32 %v737_v20, %v719_v26  ;;  %v807_v19 = vld [vmem:[%s4804_s24 + $0xa8] sm:$0xff] }
 0x199   : > { %v650_v31 = vpop.f32.mrf.mxu0  ;;  %v721_v32 = vpop.f32.mrf.mxu1  ;;  %v931_v20 = vld [vmem:[%s4804_s24 + $0x488] sm:$0xff] }
 0x19a   : > { %v772_v33 = vadd.f32 %v755_v21, %v746_v27  ;;  %v774_v34 = vadd.f32 %v763_v22, %v748_v28  ;;  %v747_v35 = vmul.f32 %v733_v23, %v650_v31  ;;  %v749_v36 = vmul.f32 %v741_v24, %v721_v32  ;;  %v935_v21 = vld [vmem:[%s4804_s24 + $0x4a8] sm:$0xff] }
 0x19b   : > { %v3702_v22 = vcombine.low %v811_v5, %v815_v6  ;;  %v3695_v24 = vcombine.high %v803_v18, %v807_v19  ;;  %v3823_v25 = vcombine.high %v931_v20, %v935_v21  ;;  %v795_v26 = vld [vmem:[%s4804_s24 + $0x48] sm:$0xff]  ;;  %v3822_v31 = vcombine.low %v931_v20, %v935_v21 }
 0x19c   : > { %v773_v37 = vadd.f32 %v759_v29, %v747_v35  ;;  %v775_v38 = vadd.f32 %v767_v30, %v749_v36  ;;  %v776_v39 = vmax.f32 %v772_v33, 0.0  ;;  %v778_v40 = vmax.f32 %v774_v34, 0.0  ;;  %v799_v27 = vld [vmem:[%s4804_s24 + $0x68] sm:$0xff] }
 0x19d   : > { %v923_v28 = vld [vmem:[%s4804_s24 + $0x448] sm:$0xff]  ;;  %v3694_v30 = vcombine.low %v803_v18, %v807_v19  ;;  %v3687_v32 = vcombine.high %v795_v26, %v799_v27 }
 0x19e   : > { %v777_v41 = vmax.f32 %v773_v37, 0.0  ;;  %v779_v42 = vmax.f32 %v775_v38, 0.0  ;;  %v4919_v49 = vpack.c.bf16 %v776_v39, %v776_v39  ;;  %v4921_v50 = vpack.c.bf16 %v778_v40, %v778_v40  ;;  %v927_v29 = vld [vmem:[%s4804_s24 + $0x468] sm:$0xff] }
 0x19f   : > { %v3815_v33 = vcombine.high %v923_v28, %v927_v29  ;;  %v787_v34 = vld [vmem:[%s4804_s24 + $0x8] sm:$0xff]  ;;  %v3686_v38 = vcombine.low %v795_v26, %v799_v27  ;;  %v3814_v39 = vcombine.low %v923_v28, %v927_v29 }
 0x1a0   : > { %v4915_v47 = vpack.c.bf16 %v777_v41, %v777_v41  ;;  %v4917_v48 = vpack.c.bf16 %v779_v42, %v779_v42  ;;  %v791_v35 = vld [vmem:[%s4804_s24 + $0x28] sm:$0xff] }
 0x1a1   : > { %v915_v36 = vld [vmem:[%s4804_s24 + $0x408] sm:$0xff]  ;;  %v3679_v40 = vcombine.high %v787_v34, %v791_v35  ;;  %v3678_v46 = vcombine.low %v787_v34, %v791_v35 }
 0x1a2   : > { %2354 = vmatprep.mubr.bf16.mxu0 %v4915_v47  ;;  %2395 = vmatprep.mubr.bf16.mxu1 %v4917_v48  ;;  %v919_v37 = vld [vmem:[%s4804_s24 + $0x428] sm:$0xff] }
 0x1a3   : > { %2355 = vmatmul.mubr.bf16.vlgmr.msra.gmra.mxu0 %v4919_v49  ;;  %2396 = vmatmul.mubr.bf16.vlgmr.msra.gmra.mxu1 %v4921_v50  ;;  %v3807_v41 = vcombine.high %v915_v36, %v919_v37  ;;  %v907_v42 = vld [vmem:[%s4804_s24 + $0x3c8] sm:$0xff]  ;;  %v3806_v51 = vcombine.low %v915_v36, %v919_v37 }
 0x1a4   : > { %2405 = vmatpush1.bf16.msra.mxu0 %v3734_v8  ;;  %2446 = vmatpush1.bf16.msra.mxu1 %v3862_v9  ;;  %v943_v8 = vld [vmem:[%s4804_s24 + $0x4e8] sm:$0xff]  ;;  %v3710_v9 = vcombine.low %v819_v61, %v823_v62 }
 0x1a5   : > { %2436 = vmatprep.mubr.bf16.mxu0 %v4915_v47  ;;  %2477 = vmatprep.mubr.bf16.mxu1 %v4917_v48  ;;  %v3831_v15 = vcombine.high %v939_v7, %v943_v8  ;;  %v3830_v23 = vcombine.low %v939_v7, %v943_v8  ;;  %v891_v62 = vld [vmem:[%s4804_s24 + $0x348] sm:$0xff] }
 0x1a6   : > { %2406 = vmatprep.subr.bf16.mxu0 %v3727_v52  ;;  %2447 = vmatprep.subr.bf16.mxu1 %v3855_v53  ;;  %v3799_v52 = vcombine.high %v907_v42, %v911_v43  ;;  %v3927_v53 = vcombine.high %v1035_v44, %v1039_v45  ;;  %v883_v6 = vld [vmem:[%s4804_s24 + $0x308] sm:$0xff] }
 0x1a7   : > { %v887_v7 = vld [vmem:[%s4804_s24 + $0x328] sm:$0xff] }
 0x1a8   : > { %2407 = vmatpush1.bf16.msra.mxu0 %v3726_v57  ;;  %2448 = vmatpush1.bf16.msra.mxu1 %v3854_v58  ;;  %v1031_v57 = vld [vmem:[%s4804_s24 + $0x7a8] sm:$0xff]  ;;  %v3798_v58 = vcombine.low %v907_v42, %v911_v43 }
 0x1a9   : > { %2408 = vmatprep.subr.bf16.mxu0 %v3719_v59  ;;  %2449 = vmatprep.subr.bf16.mxu1 %v3847_v60  ;;  %v3926_v59 = vcombine.low %v1035_v44, %v1039_v45  ;;  %v3791_v60 = vcombine.high %v899_v54, %v903_v55  ;;  %v3919_v61 = vcombine.high %v1027_v56, %v1031_v57  ;;  %v1011_v8 = vld [vmem:[%s4804_s24 + $0x708] sm:$0xff] }
 0x1aa   : > { %v875_v19 = vld [vmem:[%s4804_s24 + $0x2c8] sm:$0xff] }
 0x1ab   : > { %v879_v20 = vld [vmem:[%s4804_s24 + $0x2e8] sm:$0xff] }
 0x1ac   : > { %2409 = vmatpush1.bf16.msra.mxu0 %v3718_v1  ;;  %2450 = vmatpush1.bf16.msra.mxu1 %v3846_v2  ;;  %v1023_v1 = vld [vmem:[%s4804_s24 + $0x768] sm:$0xff]  ;;  %v3790_v2 = vcombine.low %v899_v54, %v903_v55  ;;  %v844_v55 = vld [vmem:[%s4804_s24 + $0x1d0] sm:$0xff] }
 0x1ad   : > { %2410 = vmatprep.subr.bf16.mxu0 %v3711_v3  ;;  %2451 = vmatprep.subr.bf16.mxu1 %v3839_v4  ;;  %v3918_v3 = vcombine.low %v1027_v56, %v1031_v57  ;;  %v3783_v4 = vcombine.high %v891_v62, %v895_v63  ;;  %v3911_v5 = vcombine.high %v1019_v0, %v1023_v1  ;;  %v1003_v21 = vld [vmem:[%s4804_s24 + $0x6c8] sm:$0xff]  ;;  %v848_v56 = vld [vmem:[%s4804_s24 + $0x1f0] sm:$0xff] }
 0x1ae   : > { %v867_v27 = vld [vmem:[%s4804_s24 + $0x288] sm:$0xff]  ;;  %v972_v57 = vld [vmem:[%s4804_s24 + $0x5d0] sm:$0xff] }
 0x1af   : > { %v871_v28 = vld [vmem:[%s4804_s24 + $0x2a8] sm:$0xff] }
 0x1b0   : > { %2411 = vmatpush1.bf16.msra.mxu0 %v3710_v9  ;;  %2452 = vmatpush1.bf16.msra.mxu1 %v3838_v10  ;;  %v1015_v9 = vld [vmem:[%s4804_s24 + $0x728] sm:$0xff]  ;;  %v3782_v10 = vcombine.low %v891_v62, %v895_v63  ;;  %v836_v63 = vld [vmem:[%s4804_s24 + $0x190] sm:$0xff] }
 0x1b1   : > { %2412 = vmatprep.subr.bf16.mxu0 %v3703_v11  ;;  %2453 = vmatprep.subr.bf16.mxu1 %v3831_v15  ;;  %v3910_v11 = vcombine.low %v1019_v0, %v1023_v1  ;;  %v3775_v15 = vcombine.high %v883_v6, %v887_v7  ;;  %v3903_v18 = vcombine.high %v1011_v8, %v1015_v9  ;;  %v995_v29 = vld [vmem:[%s4804_s24 + $0x688] sm:$0xff]  ;;  %v840_v0 = vld [vmem:[%s4804_s24 + $0x1b0] sm:$0xff] }
 0x1b2   : > { %v859_v35 = vld [vmem:[%s4804_s24 + $0x248] sm:$0xff]  ;;  %v964_v1 = vld [vmem:[%s4804_s24 + $0x590] sm:$0xff] }
 0x1b3   : > { %v863_v36 = vld [vmem:[%s4804_s24 + $0x268] sm:$0xff] }
 0x1b4   : > { %2413 = vmatpush1.bf16.msra.mxu0 %v3702_v22  ;;  %2454 = vmatpush1.bf16.msra.mxu1 %v3830_v23  ;;  %v1007_v22 = vld [vmem:[%s4804_s24 + $0x6e8] sm:$0xff]  ;;  %v3774_v23 = vcombine.low %v883_v6, %v887_v7  ;;  %v828_v7 = vld [vmem:[%s4804_s24 + $0x150] sm:$0xff] }
 0x1b5   : > { %2414 = vmatprep.subr.bf16.mxu0 %v3695_v24  ;;  %2455 = vmatprep.subr.bf16.mxu1 %v3823_v25  ;;  %v3902_v24 = vcombine.low %v1011_v8, %v1015_v9  ;;  %v3767_v25 = vcombine.high %v875_v19, %v879_v20  ;;  %v3895_v26 = vcombine.high %v1003_v21, %v1007_v22  ;;  %v987_v37 = vld [vmem:[%s4804_s24 + $0x648] sm:$0xff]  ;;  %v832_v8 = vld [vmem:[%s4804_s24 + $0x170] sm:$0xff] }
 0x1b6   : > { %v851_v43 = vld [vmem:[%s4804_s24 + $0x208] sm:$0xff]  ;;  %v956_v9 = vld [vmem:[%s4804_s24 + $0x550] sm:$0xff] }
 0x1b7   : > { %v855_v44 = vld [vmem:[%s4804_s24 + $0x228] sm:$0xff] }
 0x1b8   : > { %2415 = vmatpush1.bf16.msra.mxu0 %v3694_v30  ;;  %2456 = vmatpush1.bf16.msra.mxu1 %v3822_v31  ;;  %v999_v30 = vld [vmem:[%s4804_s24 + $0x6a8] sm:$0xff]  ;;  %v3766_v31 = vcombine.low %v875_v19, %v879_v20  ;;  %v820_v20 = vld [vmem:[%s4804_s24 + $0x110] sm:$0xff] }
 0x1b9   : > { %2416 = vmatprep.subr.bf16.mxu0 %v3687_v32  ;;  %2457 = vmatprep.subr.bf16.mxu1 %v3815_v33  ;;  %v3894_v32 = vcombine.low %v1003_v21, %v1007_v22  ;;  %v3759_v33 = vcombine.high %v867_v27, %v871_v28  ;;  %v3887_v34 = vcombine.high %v995_v29, %v999_v30  ;;  %v979_v45 = vld [vmem:[%s4804_s24 + $0x608] sm:$0xff]  ;;  %v824_v21 = vld [vmem:[%s4804_s24 + $0x130] sm:$0xff] }
 0x1ba   : > { %v948_v22 = vld [vmem:[%s4804_s24 + $0x510] sm:$0xff] }
 0x1bc   : > { %2417 = vmatpush1.bf16.msra.mxu0 %v3686_v38  ;;  %2458 = vmatpush1.bf16.msra.mxu1 %v3814_v39  ;;  %v991_v38 = vld [vmem:[%s4804_s24 + $0x668] sm:$0xff]  ;;  %v3758_v39 = vcombine.low %v867_v27, %v871_v28  ;;  %v812_v28 = vld [vmem:[%s4804_s24 + $0xd0] sm:$0xff] }
 0x1bd   : > { %2418 = vmatprep.subr.bf16.mxu0 %v3679_v40  ;;  %2459 = vmatprep.subr.bf16.mxu1 %v3807_v41  ;;  %v3886_v40 = vcombine.low %v995_v29, %v999_v30  ;;  %v3751_v41 = vcombine.high %v859_v35, %v863_v36  ;;  %v3879_v42 = vcombine.high %v987_v37, %v991_v38  ;;  %v816_v29 = vld [vmem:[%s4804_s24 + $0xf0] sm:$0xff] }
 0x1be   : > { %v940_v30 = vld [vmem:[%s4804_s24 + $0x4d0] sm:$0xff] }
 0x1c0   : > { %2419 = vmatpush1.bf16.msra.mxu0 %v3678_v46  ;;  %2460 = vmatpush1.bf16.msra.mxu1 %v3806_v51  ;;  %v983_v46 = vld [vmem:[%s4804_s24 + $0x628] sm:$0xff]  ;;  %v3750_v51 = vcombine.low %v859_v35, %v863_v36  ;;  %v804_v36 = vld [vmem:[%s4804_s24 + $0x90] sm:$0xff] }
 0x1c1   : > { %2420 = vmatprep.subr.bf16.mxu0 %v3799_v52  ;;  %2461 = vmatprep.subr.bf16.mxu1 %v3927_v53  ;;  %v3878_v52 = vcombine.low %v987_v37, %v991_v38  ;;  %v3743_v53 = vcombine.high %v851_v43, %v855_v44  ;;  %v3871_v54 = vcombine.high %v979_v45, %v983_v46  ;;  %v808_v37 = vld [vmem:[%s4804_s24 + $0xb0] sm:$0xff] }
 0x1c2   : > { %v932_v38 = vld [vmem:[%s4804_s24 + $0x490] sm:$0xff] }
 0x1c4   : > { %2421 = vmatpush2.bf16.msra.mxu0 %v3798_v58  ;;  %2462 = vmatpush2.bf16.msra.mxu1 %v3926_v59  ;;  %v976_v58 = vld [vmem:[%s4804_s24 + $0x5f0] sm:$0xff]  ;;  %v3742_v59 = vcombine.low %v851_v43, %v855_v44 }
 0x1c5   : > { %2422 = vmatprep.subr.bf16.mxu0 %v3791_v60  ;;  %2463 = vmatprep.subr.bf16.mxu1 %v3919_v61  ;;  %v3870_v60 = vcombine.low %v979_v45, %v983_v46  ;;  %v3737_v61 = vcombine.high %v844_v55, %v848_v56  ;;  %v3865_v62 = vcombine.high %v972_v57, %v976_v58  ;;  %v796_v44 = vld [vmem:[%s4804_s24 + $0x50] sm:$0xff] }
 0x1c6   : > { %v800_v45 = vld [vmem:[%s4804_s24 + $0x70] sm:$0xff] }
 0x1c7   : > { %v924_v46 = vld [vmem:[%s4804_s24 + $0x450] sm:$0xff] }
 0x1c8   : > { %2423 = vmatpush2.bf16.msra.mxu0 %v3790_v2  ;;  %2464 = vmatpush2.bf16.msra.mxu1 %v3918_v3  ;;  %v968_v2 = vld [vmem:[%s4804_s24 + $0x5b0] sm:$0xff]  ;;  %v3736_v3 = vcombine.low %v844_v55, %v848_v56 }
 0x1c9   : > { %2424 = vmatprep.subr.bf16.mxu0 %v3783_v4  ;;  %2465 = vmatprep.subr.bf16.mxu1 %v3911_v5  ;;  %v3864_v4 = vcombine.low %v972_v57, %v976_v58  ;;  %v3729_v5 = vcombine.high %v836_v63, %v840_v0  ;;  %v3857_v6 = vcombine.high %v964_v1, %v968_v2  ;;  %v788_v56 = vld [vmem:[%s4804_s24 + $0x10] sm:$0xff] }
 0x1ca   : > { %v792_v57 = vld [vmem:[%s4804_s24 + $0x30] sm:$0xff] }
 0x1cb   : > { %v916_v58 = vld [vmem:[%s4804_s24 + $0x410] sm:$0xff] }
 0x1cc   : > { %2425 = vmatpush2.bf16.msra.mxu0 %v3782_v10  ;;  %2466 = vmatpush2.bf16.msra.mxu1 %v3910_v11  ;;  %v960_v10 = vld [vmem:[%s4804_s24 + $0x570] sm:$0xff]  ;;  %v3728_v11 = vcombine.low %v836_v63, %v840_v0 }
 0x1cd   : > { %2426 = vmatprep.subr.bf16.mxu0 %v3775_v15  ;;  %2467 = vmatprep.subr.bf16.mxu1 %v3903_v18  ;;  %v3856_v15 = vcombine.low %v964_v1, %v968_v2  ;;  %v3721_v18 = vcombine.high %v828_v7, %v832_v8  ;;  %v3849_v19 = vcombine.high %v956_v9, %v960_v10  ;;  %v908_v0 = vld [vmem:[%s4804_s24 + $0x3d0] sm:$0xff] }
 0x1ce   : > { %v912_v1 = vld [vmem:[%s4804_s24 + $0x3f0] sm:$0xff] }
 0x1cf   : > { %v1036_v2 = vld [vmem:[%s4804_s24 + $0x7d0] sm:$0xff] }
 0x1d0   : > { %2427 = vmatpush2.bf16.msra.mxu0 %v3774_v23  ;;  %2468 = vmatpush2.bf16.msra.mxu1 %v3902_v24  ;;  %v952_v23 = vld [vmem:[%s4804_s24 + $0x530] sm:$0xff]  ;;  %v3720_v24 = vcombine.low %v828_v7, %v832_v8 }
 0x1d1   : > { %2428 = vmatprep.subr.bf16.mxu0 %v3767_v25  ;;  %2469 = vmatprep.subr.bf16.mxu1 %v3895_v26  ;;  %v3848_v25 = vcombine.low %v956_v9, %v960_v10  ;;  %v3713_v26 = vcombine.high %v820_v20, %v824_v21  ;;  %v3841_v27 = vcombine.high %v948_v22, %v952_v23  ;;  %v900_v8 = vld [vmem:[%s4804_s24 + $0x390] sm:$0xff] }
 0x1d2   : > { %v904_v9 = vld [vmem:[%s4804_s24 + $0x3b0] sm:$0xff] }
 0x1d3   : > { %v1028_v10 = vld [vmem:[%s4804_s24 + $0x790] sm:$0xff] }
 0x1d4   : > { %2429 = vmatpush2.bf16.msra.mxu0 %v3766_v31  ;;  %2470 = vmatpush2.bf16.msra.mxu1 %v3894_v32  ;;  %v944_v31 = vld [vmem:[%s4804_s24 + $0x4f0] sm:$0xff]  ;;  %v3712_v32 = vcombine.low %v820_v20, %v824_v21 }
 0x1d5   : > { %2430 = vmatprep.subr.bf16.mxu0 %v3759_v33  ;;  %2471 = vmatprep.subr.bf16.mxu1 %v3887_v34  ;;  %v3840_v33 = vcombine.low %v948_v22, %v952_v23  ;;  %v3705_v34 = vcombine.high %v812_v28, %v816_v29  ;;  %v3833_v35 = vcombine.high %v940_v30, %v944_v31  ;;  %v892_v21 = vld [vmem:[%s4804_s24 + $0x350] sm:$0xff] }
 0x1d6   : > { %v896_v22 = vld [vmem:[%s4804_s24 + $0x370] sm:$0xff] }
 0x1d7   : > { %v1020_v23 = vld [vmem:[%s4804_s24 + $0x750] sm:$0xff] }
 0x1d8   : > { %2431 = vmatpush2.bf16.msra.mxu0 %v3758_v39  ;;  %2472 = vmatpush2.bf16.msra.mxu1 %v3886_v40  ;;  %v936_v39 = vld [vmem:[%s4804_s24 + $0x4b0] sm:$0xff]  ;;  %v3704_v40 = vcombine.low %v812_v28, %v816_v29 }
 0x1d9   : > { %2432 = vmatprep.subr.bf16.mxu0 %v3751_v41  ;;  %2473 = vmatprep.subr.bf16.mxu1 %v3879_v42  ;;  %v3832_v41 = vcombine.low %v940_v30, %v944_v31  ;;  %v3697_v42 = vcombine.high %v804_v36, %v808_v37  ;;  %v3825_v43 = vcombine.high %v932_v38, %v936_v39  ;;  %v884_v29 = vld [vmem:[%s4804_s24 + $0x310] sm:$0xff] }
 0x1da   : > { %v888_v30 = vld [vmem:[%s4804_s24 + $0x330] sm:$0xff] }
 0x1db   : > { %v1012_v31 = vld [vmem:[%s4804_s24 + $0x710] sm:$0xff] }
 0x1dc   : > { %2433 = vmatpush2.bf16.msra.mxu0 %v3750_v51  ;;  %2474 = vmatpush2.bf16.msra.mxu1 %v3878_v52  ;;  %v928_v51 = vld [vmem:[%s4804_s24 + $0x470] sm:$0xff]  ;;  %v3696_v52 = vcombine.low %v804_v36, %v808_v37 }
 0x1dd   : > { %2434 = vmatprep.subr.bf16.mxu0 %v3743_v53  ;;  %2475 = vmatprep.subr.bf16.mxu1 %v3871_v54  ;;  %v3824_v53 = vcombine.low %v932_v38, %v936_v39  ;;  %v3689_v54 = vcombine.high %v796_v44, %v800_v45  ;;  %v3817_v55 = vcombine.high %v924_v46, %v928_v51  ;;  %v876_v37 = vld [vmem:[%s4804_s24 + $0x2d0] sm:$0xff] }
 0x1de   : > { %v880_v38 = vld [vmem:[%s4804_s24 + $0x2f0] sm:$0xff] }
 0x1df   : > { %v1004_v39 = vld [vmem:[%s4804_s24 + $0x6d0] sm:$0xff] }
 0x1e0   : > { %2435 = vmatpush2.bf16.msra.mxu0 %v3742_v59  ;;  %2476 = vmatpush2.bf16.msra.mxu1 %v3870_v60  ;;  %v920_v59 = vld [vmem:[%s4804_s24 + $0x430] sm:$0xff]  ;;  %v3688_v60 = vcombine.low %v796_v44, %v800_v45 }
 0x1e1   : > { %2486 = vmatprep.subr.bf16.mxu0 %v3737_v61  ;;  %2527 = vmatprep.subr.bf16.mxu1 %v3865_v62  ;;  %v3816_v61 = vcombine.low %v924_v46, %v928_v51  ;;  %v3681_v62 = vcombine.high %v788_v56, %v792_v57  ;;  %v3809_v63 = vcombine.high %v916_v58, %v920_v59  ;;  %v868_v45 = vld [vmem:[%s4804_s24 + $0x290] sm:$0xff] }
 0x1e2   : > { %v872_v46 = vld [vmem:[%s4804_s24 + $0x2b0] sm:$0xff] }
 0x1e3   : > { %2437 = vmatmul.mubr.bf16.vlgmr.msra.gmra.mxu0 %v4919_v49  ;;  %2478 = vmatmul.mubr.bf16.vlgmr.msra.gmra.mxu1 %v4921_v50  ;;  %v996_v51 = vld [vmem:[%s4804_s24 + $0x690] sm:$0xff] }
 0x1e4   : > { %2487 = vmatpush1.bf16.msra.mxu0 %v3736_v3  ;;  %2518 = vmatprep.mubr.bf16.mxu0 %v4915_v47  ;;  %v1040_v3 = vld [vmem:[%s4804_s24 + $0x7f0] sm:$0xff] }
 0x1e5   : > { %2528 = vmatpush1.bf16.msra.mxu1 %v3864_v4  ;;  %2559 = vmatprep.mubr.bf16.mxu1 %v4917_v48  ;;  %v3680_v4 = vcombine.low %v788_v56, %v792_v57  ;;  %v3929_v7 = vcombine.high %v1036_v2, %v1040_v3  ;;  %v860_v57 = vld [vmem:[%s4804_s24 + $0x250] sm:$0xff] }
 0x1e6   : > { %2488 = vmatprep.subr.bf16.mxu0 %v3729_v5  ;;  %2529 = vmatprep.subr.bf16.mxu1 %v3857_v6  ;;  %v3808_v5 = vcombine.low %v916_v58, %v920_v59  ;;  %v3801_v6 = vcombine.high %v908_v0, %v912_v1  ;;  %v864_v58 = vld [vmem:[%s4804_s24 + $0x270] sm:$0xff] }
 0x1e7   : > { %v988_v59 = vld [vmem:[%s4804_s24 + $0x650] sm:$0xff] }
 0x1e8   : > { %2489 = vmatpush1.bf16.msra.mxu0 %v3728_v11  ;;  %v1032_v11 = vld [vmem:[%s4804_s24 + $0x7b0] sm:$0xff] }
 0x1e9   : > { %2530 = vmatpush1.bf16.msra.mxu1 %v3856_v15  ;;  %2490 = vmatprep.subr.bf16.mxu0 %v3721_v18  ;;  %v3800_v15 = vcombine.low %v908_v0, %v912_v1  ;;  %v3928_v18 = vcombine.low %v1036_v2, %v1040_v3  ;;  %v3921_v20 = vcombine.high %v1028_v10, %v1032_v11  ;;  %v852_v1 = vld [vmem:[%s4804_s24 + $0x210] sm:$0xff] }
 0x1ea   : > { %2531 = vmatprep.subr.bf16.mxu1 %v3849_v19  ;;  %v3793_v19 = vcombine.high %v900_v8, %v904_v9  ;;  %v856_v2 = vld [vmem:[%s4804_s24 + $0x230] sm:$0xff] }
 0x1eb   : > { %v980_v3 = vld [vmem:[%s4804_s24 + $0x610] sm:$0xff] }
 0x1ec   : > { %2491 = vmatpush1.bf16.msra.mxu0 %v3720_v24  ;;  %v1024_v24 = vld [vmem:[%s4804_s24 + $0x770] sm:$0xff] }
 0x1ed   : > { %2532 = vmatpush1.bf16.msra.mxu1 %v3848_v25  ;;  %2492 = vmatprep.subr.bf16.mxu0 %v3713_v26  ;;  %v3792_v25 = vcombine.low %v900_v8, %v904_v9  ;;  %v3920_v26 = vcombine.low %v1028_v10, %v1032_v11  ;;  %v3913_v28 = vcombine.high %v1020_v23, %v1024_v24  ;;  %v845_v9 = vld [vmem:[%s4804_s24 + $0x1d8] sm:$0xff] }
 0x1ee   : > { %2533 = vmatprep.subr.bf16.mxu1 %v3841_v27  ;;  %v3785_v27 = vcombine.high %v892_v21, %v896_v22  ;;  %v849_v10 = vld [vmem:[%s4804_s24 + $0x1f8] sm:$0xff] }
 0x1ef   : > { %v973_v11 = vld [vmem:[%s4804_s24 + $0x5d8] sm:$0xff] }
 0x1f0   : > { %2493 = vmatpush1.bf16.msra.mxu0 %v3712_v32  ;;  %v1016_v32 = vld [vmem:[%s4804_s24 + $0x730] sm:$0xff] }
 0x1f1   : > { %2534 = vmatpush1.bf16.msra.mxu1 %v3840_v33  ;;  %2494 = vmatprep.subr.bf16.mxu0 %v3705_v34  ;;  %v3784_v33 = vcombine.low %v892_v21, %v896_v22  ;;  %v3912_v34 = vcombine.low %v1020_v23, %v1024_v24  ;;  %v3905_v36 = vcombine.high %v1012_v31, %v1016_v32  ;;  %v837_v22 = vld [vmem:[%s4804_s24 + $0x198] sm:$0xff] }
 0x1f2   : > { %2535 = vmatprep.subr.bf16.mxu1 %v3833_v35  ;;  %v3777_v35 = vcombine.high %v884_v29, %v888_v30  ;;  %v841_v23 = vld [vmem:[%s4804_s24 + $0x1b8] sm:$0xff]  ;;  %v3738_v24 = vcombine.low %v845_v9, %v849_v10 }
 0x1f4   : > { %2495 = vmatpush1.bf16.msra.mxu0 %v3704_v40  ;;  %v1008_v40 = vld [vmem:[%s4804_s24 + $0x6f0] sm:$0xff] }
 0x1f5   : > { %2536 = vmatpush1.bf16.msra.mxu1 %v3832_v41  ;;  %2496 = vmatprep.subr.bf16.mxu0 %v3697_v42  ;;  %v3776_v41 = vcombine.low %v884_v29, %v888_v30  ;;  %v3904_v42 = vcombine.low %v1012_v31, %v1016_v32  ;;  %v3897_v44 = vcombine.high %v1004_v39, %v1008_v40  ;;  %v829_v29 = vld [vmem:[%s4804_s24 + $0x158] sm:$0xff] }
 0x1f6   : > { %2537 = vmatprep.subr.bf16.mxu1 %v3825_v43  ;;  %v3769_v43 = vcombine.high %v876_v37, %v880_v38  ;;  %v833_v30 = vld [vmem:[%s4804_s24 + $0x178] sm:$0xff] }
 0x1f7   : > { %v957_v32 = vld [vmem:[%s4804_s24 + $0x558] sm:$0xff] }
 0x1f8   : > { %2497 = vmatpush1.bf16.msra.mxu0 %v3696_v52  ;;  %v1000_v52 = vld [vmem:[%s4804_s24 + $0x6b0] sm:$0xff] }
 0x1f9   : > { %2538 = vmatpush1.bf16.msra.mxu1 %v3824_v53  ;;  %2498 = vmatprep.subr.bf16.mxu0 %v3689_v54  ;;  %v3768_v53 = vcombine.low %v876_v37, %v880_v38  ;;  %v3896_v54 = vcombine.low %v1004_v39, %v1008_v40  ;;  %v3889_v56 = vcombine.high %v996_v51, %v1000_v52  ;;  %v821_v38 = vld [vmem:[%s4804_s24 + $0x118] sm:$0xff] }
 0x1fa   : > { %2539 = vmatprep.subr.bf16.mxu1 %v3817_v55  ;;  %v3761_v55 = vcombine.high %v868_v45, %v872_v46  ;;  %v825_v39 = vld [vmem:[%s4804_s24 + $0x138] sm:$0xff] }
 0x1fb   : > { %v949_v40 = vld [vmem:[%s4804_s24 + $0x518] sm:$0xff] }
 0x1fc   : > { %2499 = vmatpush1.bf16.msra.mxu0 %v3688_v60  ;;  %v992_v60 = vld [vmem:[%s4804_s24 + $0x670] sm:$0xff] }
 0x1fd   : > { %2540 = vmatpush1.bf16.msra.mxu1 %v3816_v61  ;;  %2500 = vmatprep.subr.bf16.mxu0 %v3681_v62  ;;  %v3760_v61 = vcombine.low %v868_v45, %v872_v46  ;;  %v3888_v62 = vcombine.low %v996_v51, %v1000_v52  ;;  %v3881_v0 = vcombine.high %v988_v59, %v992_v60  ;;  %v817_v45 = vld [vmem:[%s4804_s24 + $0xf8] sm:$0xff] }
 0x1fe   : > { %2541 = vmatprep.subr.bf16.mxu1 %v3809_v63  ;;  %v3753_v63 = vcombine.high %v860_v57, %v864_v58  ;;  %v941_v46 = vld [vmem:[%s4804_s24 + $0x4d8] sm:$0xff]  ;;  %v3714_v52 = vcombine.low %v821_v38, %v825_v39 }
 0x1ff   : > { %v945_v51 = vld [vmem:[%s4804_s24 + $0x4f8] sm:$0xff] }
 0x200   : > { %2501 = vmatpush1.bf16.msra.mxu0 %v3680_v4  ;;  %v984_v4 = vld [vmem:[%s4804_s24 + $0x630] sm:$0xff] }
 0x201   : > { %2542 = vmatpush1.bf16.msra.mxu1 %v3808_v5  ;;  %2502 = vmatprep.subr.bf16.mxu0 %v3801_v6  ;;  %v3752_v5 = vcombine.low %v860_v57, %v864_v58  ;;  %v3880_v6 = vcombine.low %v988_v59, %v992_v60  ;;  %v3873_v8 = vcombine.high %v980_v3, %v984_v4  ;;  %v809_v57 = vld [vmem:[%s4804_s24 + $0xb8] sm:$0xff] }
 0x202   : > { %2543 = vmatprep.subr.bf16.mxu1 %v3929_v7  ;;  %v3745_v7 = vcombine.high %v852_v1, %v856_v2  ;;  %v933_v58 = vld [vmem:[%s4804_s24 + $0x498] sm:$0xff] }
 0x203   : > { %v937_v59 = vld [vmem:[%s4804_s24 + $0x4b8] sm:$0xff] }
 0x204   : > { %2503 = vmatpush2.bf16.msra.mxu0 %v3800_v15  ;;  %v977_v15 = vld [vmem:[%s4804_s24 + $0x5f8] sm:$0xff] }
 0x205   : > { %2544 = vmatpush2.bf16.msra.mxu1 %v3928_v18  ;;  %2504 = vmatprep.subr.bf16.mxu0 %v3793_v19  ;;  %v3744_v18 = vcombine.low %v852_v1, %v856_v2  ;;  %v3872_v19 = vcombine.low %v980_v3, %v984_v4  ;;  %v3867_v21 = vcombine.high %v973_v11, %v977_v15  ;;  %v801_v1 = vld [vmem:[%s4804_s24 + $0x78] sm:$0xff] }
 0x206   : > { %2545 = vmatprep.subr.bf16.mxu1 %v3921_v20  ;;  %v3739_v20 = vcombine.high %v845_v9, %v849_v10  ;;  %v925_v2 = vld [vmem:[%s4804_s24 + $0x458] sm:$0xff] }
 0x207   : > { %v929_v3 = vld [vmem:[%s4804_s24 + $0x478] sm:$0xff] }
 0x208   : > { %2505 = vmatpush2.bf16.msra.mxu0 %v3792_v25  ;;  %v965_v25 = vld [vmem:[%s4804_s24 + $0x598] sm:$0xff] }
 0x209   : > { %2546 = vmatpush2.bf16.msra.mxu1 %v3920_v26  ;;  %2506 = vmatprep.subr.bf16.mxu0 %v3785_v27  ;;  %v969_v26 = vld [vmem:[%s4804_s24 + $0x5b8] sm:$0xff]  ;;  %v3866_v27 = vcombine.low %v973_v11, %v977_v15 }
 0x20a   : > { %2547 = vmatprep.subr.bf16.mxu1 %v3913_v28  ;;  %v3731_v28 = vcombine.high %v837_v22, %v841_v23  ;;  %v3859_v31 = vcombine.high %v965_v25, %v969_v26  ;;  %v793_v9 = vld [vmem:[%s4804_s24 + $0x38] sm:$0xff] }
 0x20b   : > { %v917_v10 = vld [vmem:[%s4804_s24 + $0x418] sm:$0xff] }
 0x20c   : > { %2507 = vmatpush2.bf16.msra.mxu0 %v3784_v33  ;;  %v961_v33 = vld [vmem:[%s4804_s24 + $0x578] sm:$0xff] }
 0x20d   : > { %2548 = vmatpush2.bf16.msra.mxu1 %v3912_v34  ;;  %2508 = vmatprep.subr.bf16.mxu0 %v3777_v35  ;;  %v3730_v34 = vcombine.low %v837_v22, %v841_v23  ;;  %v3858_v35 = vcombine.low %v965_v25, %v969_v26  ;;  %v3851_v37 = vcombine.high %v957_v32, %v961_v33  ;;  %v921_v11 = vld [vmem:[%s4804_s24 + $0x438] sm:$0xff] }
 0x20e   : > { %2549 = vmatprep.subr.bf16.mxu1 %v3905_v36  ;;  %v3723_v36 = vcombine.high %v829_v29, %v833_v30  ;;  %v913_v22 = vld [vmem:[%s4804_s24 + $0x3f8] sm:$0xff]  ;;  %v3810_v26 = vcombine.low %v917_v10, %v921_v11 }
 0x20f   : > { %v1037_v23 = vld [vmem:[%s4804_s24 + $0x7d8] sm:$0xff] }
 0x210   : > { %2509 = vmatpush2.bf16.msra.mxu0 %v3776_v41  ;;  %v953_v41 = vld [vmem:[%s4804_s24 + $0x538] sm:$0xff] }
 0x211   : > { %2550 = vmatpush2.bf16.msra.mxu1 %v3904_v42  ;;  %2510 = vmatprep.subr.bf16.mxu0 %v3769_v43  ;;  %v3722_v42 = vcombine.low %v829_v29, %v833_v30  ;;  %v3715_v43 = vcombine.high %v821_v38, %v825_v39  ;;  %v901_v29 = vld [vmem:[%s4804_s24 + $0x398] sm:$0xff] }
 0x212   : > { %2551 = vmatprep.subr.bf16.mxu1 %v3897_v44  ;;  %v813_v44 = vld [vmem:[%s4804_s24 + $0xd8] sm:$0xff] }
 0x213   : > { %v3706_v60 = vcombine.low %v813_v44, %v817_v45  ;;  %v905_v30 = vld [vmem:[%s4804_s24 + $0x3b8] sm:$0xff] }
 0x214   : > { %2511 = vmatpush2.bf16.msra.mxu0 %v3768_v53  ;;  %v3842_v53 = vcombine.low %v949_v40, %v953_v41  ;;  %v897_v38 = vld [vmem:[%s4804_s24 + $0x378] sm:$0xff] }
 0x215   : > { %2552 = vmatpush2.bf16.msra.mxu1 %v3896_v54  ;;  %2512 = vmatprep.subr.bf16.mxu0 %v3761_v55  ;;  %v3707_v54 = vcombine.high %v813_v44, %v817_v45  ;;  %v3835_v55 = vcombine.high %v941_v46, %v945_v51  ;;  %v1021_v39 = vld [vmem:[%s4804_s24 + $0x758] sm:$0xff] }
 0x216   : > { %2553 = vmatprep.subr.bf16.mxu1 %v3889_v56  ;;  %v805_v56 = vld [vmem:[%s4804_s24 + $0x98] sm:$0xff] }
 0x217   : > { %v3698_v4 = vcombine.low %v805_v56, %v809_v57  ;;  %v889_v44 = vld [vmem:[%s4804_s24 + $0x338] sm:$0xff] }
 0x218   : > { %2513 = vmatpush2.bf16.msra.mxu0 %v3760_v61  ;;  %v3834_v61 = vcombine.low %v941_v46, %v945_v51  ;;  %v1013_v45 = vld [vmem:[%s4804_s24 + $0x718] sm:$0xff] }
 0x219   : > { %2554 = vmatpush2.bf16.msra.mxu1 %v3888_v62  ;;  %2514 = vmatprep.subr.bf16.mxu0 %v3753_v63  ;;  %v3699_v62 = vcombine.high %v805_v56, %v809_v57  ;;  %v3827_v63 = vcombine.high %v933_v58, %v937_v59  ;;  %v1017_v46 = vld [vmem:[%s4804_s24 + $0x738] sm:$0xff] }
 0x21a   : > { %2555 = vmatprep.subr.bf16.mxu1 %v3881_v0  ;;  %v797_v0 = vld [vmem:[%s4804_s24 + $0x58] sm:$0xff] }
 0x21b   : > { %v3690_v15 = vcombine.low %v797_v0, %v801_v1  ;;  %v881_v56 = vld [vmem:[%s4804_s24 + $0x2f8] sm:$0xff] }
 0x21c   : > { %2515 = vmatpush2.bf16.msra.mxu0 %v3752_v5  ;;  %v3826_v5 = vcombine.low %v933_v58, %v937_v59  ;;  %v1005_v57 = vld [vmem:[%s4804_s24 + $0x6d8] sm:$0xff] }
 0x21d   : > { %2556 = vmatpush2.bf16.msra.mxu1 %v3880_v6  ;;  %2516 = vmatprep.subr.bf16.mxu0 %v3745_v7  ;;  %v3691_v6 = vcombine.high %v797_v0, %v801_v1  ;;  %v3819_v7 = vcombine.high %v925_v2, %v929_v3  ;;  %v1009_v58 = vld [vmem:[%s4804_s24 + $0x6f8] sm:$0xff] }
 0x21e   : > { %2557 = vmatprep.subr.bf16.mxu1 %v3873_v8  ;;  %v789_v8 = vld [vmem:[%s4804_s24 + $0x18] sm:$0xff] }
 0x21f   : > { %v3682_v25 = vcombine.low %v789_v8, %v793_v9  ;;  %v873_v0 = vld [vmem:[%s4804_s24 + $0x2b8] sm:$0xff] }
 0x220   : > { %2517 = vmatpush2.bf16.msra.mxu0 %v3744_v18  ;;  %v3818_v18 = vcombine.low %v925_v2, %v929_v3  ;;  %v997_v1 = vld [vmem:[%s4804_s24 + $0x698] sm:$0xff] }
 0x221   : > { %2558 = vmatpush2.bf16.msra.mxu1 %v3872_v19  ;;  %2568 = vmatprep.subr.bf16.mxu0 %v3739_v20  ;;  %v3683_v19 = vcombine.high %v789_v8, %v793_v9  ;;  %v3811_v20 = vcombine.high %v917_v10, %v921_v11  ;;  %v1001_v2 = vld [vmem:[%s4804_s24 + $0x6b8] sm:$0xff] }
 0x222   : > { %2609 = vmatprep.subr.bf16.mxu1 %v3867_v21  ;;  %v909_v21 = vld [vmem:[%s4804_s24 + $0x3d8] sm:$0xff] }
 0x223   : > { %2519 = vmatmul.mubr.bf16.vlgmr.msra.gmra.mxu0 %v4919_v49  ;;  %v865_v8 = vld [vmem:[%s4804_s24 + $0x278] sm:$0xff] }
 0x224   : > { %2560 = vmatmul.mubr.bf16.vlgmr.msra.gmra.mxu1 %v4921_v50  ;;  %2569 = vmatpush1.bf16.msra.mxu0 %v3738_v24  ;;  %v1041_v24 = vld [vmem:[%s4804_s24 + $0x7f8] sm:$0xff] }
 0x225   : > { %2600 = vmatprep.mubr.bf16.mxu0 %v4915_v47  ;;  %2610 = vmatpush1.bf16.msra.mxu1 %v3866_v27  ;;  %v3850_v47 = vcombine.low %v957_v32, %v961_v33  ;;  %v3803_v27 = vcombine.high %v909_v21, %v913_v22  ;;  %v1033_v32 = vld [vmem:[%s4804_s24 + $0x7b8] sm:$0xff]  ;;  %v3802_v33 = vcombine.low %v909_v21, %v913_v22 }
 0x226   : > { %2641 = vmatprep.mubr.bf16.mxu1 %v4917_v48  ;;  %2570 = vmatprep.subr.bf16.mxu0 %v3731_v28  ;;  %v3843_v48 = vcombine.high %v949_v40, %v953_v41  ;;  %v3931_v28 = vcombine.high %v1037_v23, %v1041_v24  ;;  %v1025_v40 = vld [vmem:[%s4804_s24 + $0x778] sm:$0xff]  ;;  %v3794_v41 = vcombine.low %v901_v29, %v905_v30 }
 0x227   : > { %2611 = vmatprep.subr.bf16.mxu1 %v3859_v31  ;;  %v1029_v31 = vld [vmem:[%s4804_s24 + $0x798] sm:$0xff] }
 0x228   : > { %2571 = vmatpush1.bf16.msra.mxu0 %v3730_v34  ;;  %v3930_v34 = vcombine.low %v1037_v23, %v1041_v24  ;;  %v989_v9 = vld [vmem:[%s4804_s24 + $0x658] sm:$0xff] }
 0x229   : > { %2612 = vmatpush1.bf16.msra.mxu1 %v3858_v35  ;;  %2572 = vmatprep.subr.bf16.mxu0 %v3723_v36  ;;  %v3795_v35 = vcombine.high %v901_v29, %v905_v30  ;;  %v3923_v36 = vcombine.high %v1029_v31, %v1033_v32  ;;  %v993_v10 = vld [vmem:[%s4804_s24 + $0x678] sm:$0xff] }
 0x22a   : > { %2613 = vmatprep.subr.bf16.mxu1 %v3851_v37  ;;  %v893_v37 = vld [vmem:[%s4804_s24 + $0x358] sm:$0xff] }
 0x22b   : > { %v3786_v51 = vcombine.low %v893_v37, %v897_v38  ;;  %v857_v21 = vld [vmem:[%s4804_s24 + $0x238] sm:$0xff] }
 0x22c   : > { %2573 = vmatpush1.bf16.msra.mxu0 %v3722_v42  ;;  %v3922_v42 = vcombine.low %v1029_v31, %v1033_v32  ;;  %v981_v22 = vld [vmem:[%s4804_s24 + $0x618] sm:$0xff] }
 0x22d   : > { %2614 = vmatpush1.bf16.msra.mxu1 %v3850_v47  ;;  %2574 = vmatprep.subr.bf16.mxu0 %v3715_v43  ;;  %v3787_v47 = vcombine.high %v893_v37, %v897_v38  ;;  %v3915_v43 = vcombine.high %v1021_v39, %v1025_v40  ;;  %v985_v23 = vld [vmem:[%s4804_s24 + $0x638] sm:$0xff] }
 0x22e   : > { %2615 = vmatprep.subr.bf16.mxu1 %v3843_v48  ;;  %v885_v48 = vld [vmem:[%s4804_s24 + $0x318] sm:$0xff]  ;;  %v3874_v29 = vcombine.low %v981_v22, %v985_v23 }
 0x22f   : > { %v3778_v59 = vcombine.low %v885_v48, %v889_v44 }
 0x230   : > { %2575 = vmatpush1.bf16.msra.mxu0 %v3714_v52  ;;  %v3914_v52 = vcombine.low %v1021_v39, %v1025_v40 }
 0x231   : > { %2616 = vmatpush1.bf16.msra.mxu1 %v3842_v53  ;;  %2576 = vmatprep.subr.bf16.mxu0 %v3707_v54  ;;  %v3779_v53 = vcombine.high %v885_v48, %v889_v44  ;;  %v3907_v54 = vcombine.high %v1013_v45, %v1017_v46 }
 0x232   : > { %2617 = vmatprep.subr.bf16.mxu1 %v3835_v55  ;;  %v877_v55 = vld [vmem:[%s4804_s24 + $0x2d8] sm:$0xff] }
 0x233   : > { %v3770_v3 = vcombine.low %v877_v55, %v881_v56 }
 0x234   : > { %2577 = vmatpush1.bf16.msra.mxu0 %v3706_v60  ;;  %v3906_v60 = vcombine.low %v1013_v45, %v1017_v46 }
 0x235   : > { %2618 = vmatpush1.bf16.msra.mxu1 %v3834_v61  ;;  %2578 = vmatprep.subr.bf16.mxu0 %v3699_v62  ;;  %v3771_v61 = vcombine.high %v877_v55, %v881_v56  ;;  %v3899_v62 = vcombine.high %v1005_v57, %v1009_v58 }
 0x236   : > { %2619 = vmatprep.subr.bf16.mxu1 %v3827_v63  ;;  %v869_v63 = vld [vmem:[%s4804_s24 + $0x298] sm:$0xff] }
 0x237   : > { %v3762_v11 = vcombine.low %v869_v63, %v873_v0 }
 0x238   : > { %2579 = vmatpush1.bf16.msra.mxu0 %v3698_v4  ;;  %v3898_v4 = vcombine.low %v1005_v57, %v1009_v58  ;;  %v780_v58 = vld [vmem:[#allocation2] sm:$0xff] }
 0x239   : > { %2620 = vmatpush1.bf16.msra.mxu1 %v3826_v5  ;;  %2580 = vmatprep.subr.bf16.mxu0 %v3691_v6  ;;  %v3763_v5 = vcombine.high %v869_v63, %v873_v0  ;;  %v3891_v6 = vcombine.high %v997_v1, %v1001_v2 }
 0x23a   : > { %2621 = vmatprep.subr.bf16.mxu1 %v3819_v7  ;;  %v861_v7 = vld [vmem:[%s4804_s24 + $0x258] sm:$0xff] }
 0x23b   : > { %v3754_v24 = vcombine.low %v861_v7, %v865_v8 }
 0x23c   : > { %2581 = vmatpush1.bf16.msra.mxu0 %v3690_v15  ;;  %v3890_v15 = vcombine.low %v997_v1, %v1001_v2 }
 0x23d   : > { %2622 = vmatpush1.bf16.msra.mxu1 %v3818_v18  ;;  %2582 = vmatprep.subr.bf16.mxu0 %v3683_v19  ;;  %v3755_v18 = vcombine.high %v861_v7, %v865_v8  ;;  %v3883_v19 = vcombine.high %v989_v9, %v993_v10 }
 0x23e   : > { %2623 = vmatprep.subr.bf16.mxu1 %v3811_v20  ;;  %v853_v20 = vld [vmem:[%s4804_s24 + $0x218] sm:$0xff] }
 0x240   : > { %2583 = vmatpush1.bf16.msra.mxu0 %v3682_v25  ;;  %v3882_v25 = vcombine.low %v989_v9, %v993_v10 }
 0x241   : > { %2624 = vmatpush1.bf16.msra.mxu1 %v3810_v26  ;;  %2584 = vmatprep.subr.bf16.mxu0 %v3803_v27  ;;  %v3747_v26 = vcombine.high %v853_v20, %v857_v21  ;;  %v3875_v27 = vcombine.high %v981_v22, %v985_v23 }
 0x242   : > { %2625 = vmatprep.subr.bf16.mxu1 %v3931_v28  ;;  %v3746_v28 = vcombine.low %v853_v20, %v857_v21 }
 0x244   : > { %2585 = vmatpush2.bf16.msra.mxu0 %v3802_v33 }
 0x245   : > { %2626 = vmatpush2.bf16.msra.mxu1 %v3930_v34  ;;  %2586 = vmatprep.subr.bf16.mxu0 %v3795_v35 }
 0x246   : > { %2627 = vmatprep.subr.bf16.mxu1 %v3923_v36 }
 0x248   : > { %2587 = vmatpush2.bf16.msra.mxu0 %v3794_v41  ;;  %v4575_v41 = vmov 1983009808  }
 0x249   : > { %2628 = vmatpush2.bf16.msra.mxu1 %v3922_v42  ;;  %2588 = vmatprep.subr.bf16.mxu0 %v3787_v47  ;;  %v2661_v42 = vunpack.c.l.s4 %v4575_v41 }
 0x24a   : > { %2629 = vmatprep.subr.bf16.mxu1 %v3915_v43 }
 0x24b   : > { %v2662_v47 = vunpack.c.0.s8 %v2661_v42 }
 0x24c   : > { %2589 = vmatpush2.bf16.msra.mxu0 %v3786_v51 }
 0x24d   : > { %2630 = vmatpush2.bf16.msra.mxu1 %v3914_v52  ;;  %2590 = vmatprep.subr.bf16.mxu0 %v3779_v53  ;;  %v5124_v45 = vsub.s32 %v2662_v47, %v4889_v12 }
 0x24e   : > { %2631 = vmatprep.subr.bf16.mxu1 %v3907_v54 }
 0x250   : > { %2591 = vmatpush2.bf16.msra.mxu0 %v3778_v59 }
 0x251   : > { %2632 = vmatpush2.bf16.msra.mxu1 %v3906_v60  ;;  %2592 = vmatprep.subr.bf16.mxu0 %v3771_v61 }
 0x252   : > { %2633 = vmatprep.subr.bf16.mxu1 %v3899_v62 }
 0x254   : > { %2593 = vmatpush2.bf16.msra.mxu0 %v3770_v3 }
 0x255   : > { %2634 = vmatpush2.bf16.msra.mxu1 %v3898_v4  ;;  %2594 = vmatprep.subr.bf16.mxu0 %v3763_v5 }
 0x256   : > { %2635 = vmatprep.subr.bf16.mxu1 %v3891_v6 }
 0x258   : > { %2595 = vmatpush2.bf16.msra.mxu0 %v3762_v11 }
 0x259   : > { %2636 = vmatpush2.bf16.msra.mxu1 %v3890_v15  ;;  %2596 = vmatprep.subr.bf16.mxu0 %v3755_v18 }
 0x25a   : > { %2637 = vmatprep.subr.bf16.mxu1 %v3883_v19 }
 0x25c   : > { %2597 = vmatpush2.bf16.msra.mxu0 %v3754_v24 }
 0x25d   : > { %2638 = vmatpush2.bf16.msra.mxu1 %v3882_v25  ;;  %2598 = vmatprep.subr.bf16.mxu0 %v3747_v26  ;;  %v781_v26 = vld [vmem:[#allocation2 + $0x8] sm:$0xff] }
 0x25e   : > { %2639 = vmatprep.subr.bf16.mxu1 %v3875_v27 }
 0x260   : > { %2599 = vmatpush2.bf16.msra.mxu0 %v3746_v28 }
 0x261   : > { %2640 = vmatpush2.bf16.msra.mxu1 %v3874_v29 }
 0x263   : > { %2601 = vmatmul.mubr.bf16.vlgmr.msra.gmra.mxu0 %v4919_v49  ;;  %v2356_v30 = vpop.f32.mrf.mxu0  ;;  %v2397_v31 = vpop.f32.mrf.mxu1 }
 0x264   : > { %2642 = vmatmul.mubr.bf16.vlgmr.msra.gmra.mxu1 %v4921_v50  ;;  %v2398_v32 = vadd.f32 %v2397_v31, %v2356_v30 }
 0x265   : > { %v2358_v33 = vpop.f32.mrf.mxu0  ;;  %v2399_v34 = vpop.f32.mrf.mxu1 }
 0x266   : > { %v2400_v35 = vadd.f32 %v2399_v34, %v2358_v33 }
 0x267   : > { %v2360_v36 = vpop.f32.mrf.mxu0  ;;  %v2401_v37 = vpop.f32.mrf.mxu1 }
 0x268   : > { %v2658_v38 = vcombine.low %v2398_v32, %v2400_v35 }
 0x269   : > { %v2361_v39 = vpop.f32.mrf.mxu0  ;;  %v2402_v40 = vpop.f32.mrf.mxu1 }
 0x26a   : > { %v2666_v56 = vrot.slane %v2658_v38, %v5124_v45 }
 0x2a3   : > { %v2438_v43 = vpop.f32.mrf.mxu0  ;;  %v2479_v48 = vpop.f32.mrf.mxu1 }
 0x2a4   : > { %v2480_v50 = vadd.f32 %v2479_v48, %v2438_v43 }
 0x2a5   : > { %v2440_v44 = vpop.f32.mrf.mxu0  ;;  %v2481_v49 = vpop.f32.mrf.mxu1 }
 0x2a6   : > { %v2482_v46 = vadd.f32 %v2481_v49, %v2440_v44 }
 0x2a7   : > { %v2442_v51 = vpop.f32.mrf.mxu0  ;;  %v2483_v52 = vpop.f32.mrf.mxu1 }
 0x2a8   : > { %v2659_v53 = vcombine.low %v2480_v50, %v2482_v46 }
 0x2a9   : > { %v2443_v54 = vpop.f32.mrf.mxu0  ;;  %v2484_v55 = vpop.f32.mrf.mxu1 }
 0x2aa   : > { %v2673_v57 = vrot.slane %v2659_v53, %v5124_v45 }
 0x2ac   : > { %v2674_v59 = vcombine.low %v2666_v56, %v2673_v57 }
 0x2ae   : > { %v2694_v60 = vadd.f32 %v2674_v59, %v780_v58 }
 0x2b0   : > { %2696 = vst [vmem:[#allocation2] sm:$0xff] %v2694_v60 }
 0x2e3   : > { %v2520_v61 = vpop.f32.mrf.mxu0 }
 0x2e4   : > { %v2561_v62 = vpop.f32.mrf.mxu1 }
 0x2e5   : > { %v2562_v63 = vadd.f32 %v2561_v62, %v2520_v61  ;;  %v2522_v0 = vpop.f32.mrf.mxu0 }
 0x2e6   : > { %v2563_v1 = vpop.f32.mrf.mxu1 }
 0x2e7   : > { %v2564_v2 = vadd.f32 %v2563_v1, %v2522_v0  ;;  %v2524_v3 = vpop.f32.mrf.mxu0 }
 0x2e8   : > { %v2565_v4 = vpop.f32.mrf.mxu1 }
 0x2e9   : > { %v2675_v5 = vcombine.low %v2562_v63, %v2564_v2  ;;  %v2525_v6 = vpop.f32.mrf.mxu0 }
 0x2ea   : > { %v2566_v7 = vpop.f32.mrf.mxu1 }
 0x2eb   : > { %v2683_v24 = vrot.slane %v2675_v5, %v5124_v45 }
 0x323   : > { %v2602_v8 = vpop.f32.mrf.mxu0 }
 0x324   : > { %v2643_v9 = vpop.f32.mrf.mxu1 }
 0x325   : > { %v2604_v10 = vpop.f32.mrf.mxu0  ;;  %v2644_v15 = vadd.f32 %v2643_v9, %v2602_v8 }
 0x326   : > { %v2645_v11 = vpop.f32.mrf.mxu1 }
 0x327   : > { %v2646_v18 = vadd.f32 %v2645_v11, %v2604_v10  ;;  %v2606_v19 = vpop.f32.mrf.mxu0 }
 0x328   : > { %v2647_v20 = vpop.f32.mrf.mxu1 }
 0x329   : > { %v2676_v21 = vcombine.low %v2644_v15, %v2646_v18  ;;  %v2607_v22 = vpop.f32.mrf.mxu0 }
 0x32a   : > { %v2648_v23 = vpop.f32.mrf.mxu1 }
 0x32b   : > { %v2690_v25 = vrot.slane %v2676_v21, %v5124_v45 }
 0x32d   : > { %v2691_v27 = vcombine.low %v2683_v24, %v2690_v25  ;;  %2701 = sbr.rel (%p3932_p12) target bundleno = 1086 (0x43e), region = 88 }
 0x32f   : > { %v2695_v28 = vadd.f32 %v2691_v27, %v781_v26 }
 0x331   : > { %2697 = vst [vmem:[#allocation2 + $0x8] sm:$0xff] %v2695_v28 }
 0x332   : > { %v4215_v29 = vld [vmem:[%s5375_s6 + $0x78] sm:$0xff]   ;;  %v4219_v33 = vld [vmem:[%s5375_s6 + $0x70] sm:$0xff]   ;;  %v4223_v37 = vld [vmem:[%s5375_s6 + $0x68] sm:$0xff]   ;;  %v2724_v9 = vsub.s32 4, %v4889_v12  ;;  %v2728_v10 = vsub.s32 5, %v4889_v12  ;;  %v2732_v18 = vsub.s32 6, %v4889_v12 }
 0x333   : > { %v4216_v30 = vld [vmem:[%s5375_s6 + $0xf8] sm:$0xff]   ;;  %4005 = vmatprep.subr.bf16.mxu0 %v4215_v29  ;;  %v4220_v34 = vld [vmem:[%s5375_s6 + $0xf0] sm:$0xff]   ;;  %v4224_v38 = vld [vmem:[%s5375_s6 + $0xe8] sm:$0xff]   ;;  %v2736_v19 = vsub.s32 7, %v4889_v12  ;;  %vm3509_vm0 = vcmask 50176  }
 0x334   : > { %v4217_v31 = vld [vmem:[%s5375_s6 + $0x38] sm:$0xff]   ;;  %4027 = vmatprep.subr.bf16.mxu1 %v4216_v30  ;;  %v4221_v35 = vld [vmem:[%s5375_s6 + $0x30] sm:$0xff]   ;;  %v4225_v39 = vld [vmem:[%s5375_s6 + $0x28] sm:$0xff]  }
 0x335   : > { %v4218_v32 = vld [vmem:[%s5375_s6 + $0xb8] sm:$0xff]   ;;  %4006 = vmatpush3.bf16.msra.mxu0 %v4217_v31  ;;  %v4222_v36 = vld [vmem:[%s5375_s6 + $0xb0] sm:$0xff]   ;;  %v4226_v40 = vld [vmem:[%s5375_s6 + $0xa8] sm:$0xff]  }
 0x336   : > { %4028 = vmatpush3.bf16.msra.mxu1 %v4218_v32  ;;  %4007 = vmatprep.subr.bf16.mxu0 %v4219_v33  ;;  %v4227_v41 = vld [vmem:[%s5375_s6 + $0x60] sm:$0xff]   ;;  %v4231_v48 = vld [vmem:[%s5375_s6 + $0x58] sm:$0xff]   ;;  %v4235_v46 = vld [vmem:[%s5375_s6 + $0x50] sm:$0xff]  }
 0x337   : > { %4029 = vmatprep.subr.bf16.mxu1 %v4220_v34  ;;  %v4228_v42 = vld [vmem:[%s5375_s6 + $0xe0] sm:$0xff]   ;;  %v4232_v44 = vld [vmem:[%s5375_s6 + $0xd8] sm:$0xff]   ;;  %v4236_v51 = vld [vmem:[%s5375_s6 + $0xd0] sm:$0xff]  }
 0x338   : > { %v4229_v47 = vld [vmem:[%s5375_s6 + $0x20] sm:$0xff]   ;;  %v4233_v49 = vld [vmem:[%s5375_s6 + $0x18] sm:$0xff]   ;;  %v4237_v52 = vld [vmem:[%s5375_s6 + $0x10] sm:$0xff]  }
 0x339   : > { %4008 = vmatpush3.bf16.msra.mxu0 %v4221_v35  ;;  %v4230_v43 = vld [vmem:[%s5375_s6 + $0xa0] sm:$0xff]   ;;  %v4234_v50 = vld [vmem:[%s5375_s6 + $0x98] sm:$0xff]   ;;  %v4238_v53 = vld [vmem:[%s5375_s6 + $0x90] sm:$0xff]  }
 0x33a   : > { %4030 = vmatpush3.bf16.msra.mxu1 %v4222_v36  ;;  %4009 = vmatprep.subr.bf16.mxu0 %v4223_v37  ;;  %v4239_v54 = vld [vmem:[%s5375_s6 + $0x48] sm:$0xff]   ;;  %v4243_v58 = vld [vmem:[%s5375_s6 + $0x40] sm:$0xff]   ;;  %v4247_v3 = vld [vmem:[%s5375_s6 + $0x178] sm:$0xff]  }
 0x33b   : > { %4031 = vmatprep.subr.bf16.mxu1 %v4224_v38  ;;  %v4240_v55 = vld [vmem:[%s5375_s6 + $0xc8] sm:$0xff]   ;;  %v4244_v59 = vld [vmem:[%s5375_s6 + $0xc0] sm:$0xff]   ;;  %v4248_v4 = vld [vmem:[%s5375_s6 + $0x1f8] sm:$0xff]  }
 0x33c   : > { %v4241_v56 = vld [vmem:[%s5375_s6 + $0x8] sm:$0xff]   ;;  %v4245_v60 = vld [vmem:[%s5375_s6] sm:$0xff]   ;;  %v4249_v27 = vld [vmem:[%s5375_s6 + $0x138] sm:$0xff]  }
 0x33d   : > { %4010 = vmatpush3.bf16.msra.mxu0 %v4225_v39  ;;  %v4242_v57 = vld [vmem:[%s5375_s6 + $0x88] sm:$0xff]   ;;  %v4246_v61 = vld [vmem:[%s5375_s6 + $0x80] sm:$0xff]   ;;  %v4251_v31 = vld [vmem:[%s5375_s6 + $0x170] sm:$0xff]  }
 0x33e   : > { %4032 = vmatpush3.bf16.msra.mxu1 %v4226_v40  ;;  %4011 = vmatprep.subr.bf16.mxu0 %v4227_v41  ;;  %v2704_v62 = vld [vmem:[#allocation12] sm:$0xff]  ;;  %v4250_v32 = vld [vmem:[%s5375_s6 + $0x1b8] sm:$0xff]   ;;  %v4252_v33 = vld [vmem:[%s5375_s6 + $0x1f0] sm:$0xff]  }
 0x33f   : > { %4033 = vmatprep.subr.bf16.mxu1 %v4228_v42  ;;  %v2709_v63 = vrot.slane %v2704_v62, %v4892_v13  ;;  %v2713_v0 = vrot.slane %v2704_v62, %v4898_v16  ;;  %v2717_v1 = vrot.slane %v2704_v62, %v4895_v14  ;;  %v2721_v2 = vrot.slane %v2704_v62, %v4901_v17  ;;  %v2702_v7 = vld [vmem:[#allocation2] sm:$0xff]  ;;  %v4253_v34 = vld [vmem:[%s5375_s6 + $0x130] sm:$0xff]   ;;  %v4255_v37 = vld [vmem:[%s5375_s6 + $0x168] sm:$0xff]  }
 0x340   : > { %v2725_v23 = vrot.slane %v2704_v62, %v2724_v9  ;;  %v2729_v24 = vrot.slane %v2704_v62, %v2728_v10  ;;  %v2733_v28 = vrot.slane %v2704_v62, %v2732_v18  ;;  %v2737_v29 = vrot.slane %v2704_v62, %v2736_v19  ;;  %v4254_v38 = vld [vmem:[%s5375_s6 + $0x1b0] sm:$0xff]   ;;  %v4256_v39 = vld [vmem:[%s5375_s6 + $0x1e8] sm:$0xff]  }
 0x341   : > { %4012 = vmatpush3.bf16.msra.mxu0 %v4229_v47  ;;  %v2738_v5 = vcombine.low %v2709_v63, %v2713_v0  ;;  %v2739_v6 = vcombine.low %v2717_v1, %v2721_v2  ;;  %v4257_v40 = vld [vmem:[%s5375_s6 + $0x128] sm:$0xff]   ;;  %v4259_v47 = vld [vmem:[%s5375_s6 + $0x160] sm:$0xff]   ;;  %v4270_v63 = vld [vmem:[%s5375_s6 + $0x190] sm:$0xff]  }
 0x342   : > { %4034 = vmatpush3.bf16.msra.mxu1 %v4230_v43  ;;  %4013 = vmatprep.subr.bf16.mxu0 %v4231_v48  ;;  %v2755_v35 = vcombine.low %v2725_v23, %v2729_v24  ;;  %v2756_v36 = vcombine.low %v2733_v28, %v2737_v29  ;;  %v4258_v43 = vld [vmem:[%s5375_s6 + $0x1a8] sm:$0xff]   ;;  %v4260_v48 = vld [vmem:[%s5375_s6 + $0x1e0] sm:$0xff]  }
 0x343   : > { %4035 = vmatprep.subr.bf16.mxu1 %v4232_v44  ;;  %v2746_v13 = vrot.slane %v2738_v5, %v5124_v45  ;;  %v2753_v16 = vrot.slane %v2739_v6, %v5124_v45  ;;  %v4261_v44 = vld [vmem:[%s5375_s6 + $0x120] sm:$0xff]   ;;  %v4271_v62 = vld [vmem:[%s5375_s6 + $0x148] sm:$0xff]  }
 0x344   : > { %v2763_v41 = vrot.slane %v2755_v35, %v5124_v45  ;;  %v2770_v42 = vrot.slane %v2756_v36, %v5124_v45  ;;  %v4272_v2 = vld [vmem:[%s5375_s6 + $0x1c8] sm:$0xff]   ;;  %v4275_v6 = vld [vmem:[%s5375_s6 + $0x140] sm:$0xff]  }
 0x345   : > { %4014 = vmatpush3.bf16.msra.mxu0 %v4233_v49  ;;  %v2754_v14 = vcombine.low %v2746_v13, %v2753_v16  ;;  %v4276_v16 = vld [vmem:[%s5375_s6 + $0x1c0] sm:$0xff]   ;;  %v3933_v23 = vld [vmem:[#allocation13] ss:$0 sm:$0xff] }
 0x346   : > { %4036 = vmatpush3.bf16.msra.mxu1 %v4234_v50  ;;  %4015 = vmatprep.subr.bf16.mxu0 %v4235_v46  ;;  %v2771_v49 = vcombine.low %v2763_v41, %v2770_v42  ;;  %v4263_v50 = vld [vmem:[%s5375_s6 + $0x158] sm:$0xff]   ;;  %v4262_v46 = vld [vmem:[%s5375_s6 + $0x1a0] sm:$0xff]  }
 0x347   : > { %4037 = vmatprep.subr.bf16.mxu1 %v4236_v51  ;;  %v2774_v8 = vadd.f32 %v2754_v14, %v2702_v7  ;;  %v4264_v51 = vld [vmem:[%s5375_s6 + $0x1d8] sm:$0xff]   ;;  %v4277_v7 = vld [vmem:[%s5375_s6 + $0x100] sm:$0xff]  }
 0x348   : > { %v4278_v14 = vld [vmem:[%s5375_s6 + $0x180] sm:$0xff]  }
 0x349   : > { %4016 = vmatpush3.bf16.msra.mxu0 %v4237_v52  ;;  %v2776_v17 = vmax.f32 %v2774_v8, 0.0  ;;  %v2703_v52 = vld [vmem:[#allocation2 + $0x8] sm:$0xff] }
 0x34a   : > { %4038 = vmatpush3.bf16.msra.mxu1 %v4238_v53  ;;  %4017 = vmatprep.subr.bf16.mxu0 %v4239_v54  ;;  %v4265_v53 = vld [vmem:[%s5375_s6 + $0x118] sm:$0xff]   ;;  %v2775_v54 = vadd.f32 %v2771_v49, %v2703_v52 }
 0x34b   : > { %4039 = vmatprep.subr.bf16.mxu1 %v4240_v55  ;;  %v2787_v11 = vrot.slane %v2776_v17, %v5124_v45  ;;  %v2780_v15 = vcombine.high %v2776_v17, %v2776_v17  ;;  %v4267_v55 = vld [vmem:[%s5375_s6 + $0x150] sm:$0xff]  }
 0x34d   : > { %4018 = vmatpush3.bf16.msra.mxu0 %v4241_v56  ;;  %v2795_v20 = vcombine.high %v2787_v11, %v2787_v11  ;;  %v2794_v21 = vrot.slane %v2780_v15, %v5124_v45  ;;  %v2822_v22 = vpack.c.bf16 %v2787_v11, %v2787_v11  ;;  %v4266_v56 = vld [vmem:[%s5375_s6 + $0x198] sm:$0xff]  }
 0x34e   : > { %4040 = vmatpush3.bf16.msra.mxu1 %v4242_v57  ;;  %4019 = vmatprep.subr.bf16.mxu0 %v4243_v58  ;;  %v2777_v57 = vmax.f32 %v2775_v54, 0.0  ;;  %v4268_v58 = vld [vmem:[%s5375_s6 + $0x1d0] sm:$0xff]  }
 0x34f   : > { %4041 = vmatprep.subr.bf16.mxu1 %v4244_v59  ;;  %v2823_v25 = vpack.c.bf16 %v2795_v20, %v2795_v20  ;;  %v2796_v26 = vcombine.high %v2794_v21, %v2794_v21  ;;  %v2824_v30 = vpack.c.bf16 %v2794_v21, %v2794_v21  ;;  %v4269_v59 = vld [vmem:[%s5375_s6 + $0x110] sm:$0xff]  }
 0x351   : > { %4020 = vmatpush3.bf16.msra.mxu0 %v4245_v60  ;;  %3381 = vmatprep.mubr.bf16.mxu0 %v2823_v25  ;;  %v2825_v12 = vpack.c.bf16 %v2796_v26, %v2796_v26  ;;  %v2804_v60 = vrot.slane %v2777_v57, %v5124_v45 }
 0x352   : > { %4042 = vmatpush3.bf16.msra.mxu1 %v4246_v61  ;;  %4049 = vmatprep.subr.bf16.mxu0 %v4247_v3  ;;  %v2797_v61 = vcombine.high %v2777_v57, %v2777_v57  ;;  %v4273_v3 = vld [vmem:[%s5375_s6 + $0x108] sm:$0xff]  }
 0x353   : > { %4071 = vmatprep.subr.bf16.mxu1 %v4248_v4  ;;  %3421 = vmatprep.mubr.bf16.mxu1 %v2825_v12  ;;  %v2812_v0 = vcombine.high %v2804_v60, %v2804_v60  ;;  %v2826_v8 = vpack.c.bf16 %v2804_v60, %v2804_v60 }
 0x354   : > { %3382 = vmatmul.mubr.bf16.vlgmr.msra.gmra.mxu0 %v2822_v22  ;;  %v2811_v1 = vrot.slane %v2797_v61, %v5124_v45  ;;  %v4274_v45 = vld [vmem:[%s5375_s6 + $0x188] sm:$0xff]  }
 0x355   : > { %4050 = vmatpush3.bf16.msra.mxu0 %v4249_v27  ;;  %3422 = vmatmul.mubr.bf16.vlgmr.msra.gmra.mxu1 %v2824_v30  ;;  %v2827_v4 = vpack.c.bf16 %v2812_v0, %v2812_v0 }
 0x356   : > { %4051 = vmatprep.subr.bf16.mxu0 %v4251_v31  ;;  %4072 = vmatpush3.bf16.msra.mxu1 %v4250_v32  ;;  %v2813_v5 = vcombine.high %v2811_v1, %v2811_v1  ;;  %v2828_v17 = vpack.c.bf16 %v2811_v1, %v2811_v1 }
 0x357   : > { %4073 = vmatprep.subr.bf16.mxu1 %v4252_v33  ;;  %3461 = vmatprep.mubr.bf16.mxu0 %v2827_v4 }
 0x358   : > { %v2829_v13 = vpack.c.bf16 %v2813_v5, %v2813_v5 }
 0x359   : > { %4052 = vmatpush3.bf16.msra.mxu0 %v4253_v34 }
 0x35a   : > { %4053 = vmatprep.subr.bf16.mxu0 %v4255_v37  ;;  %4074 = vmatpush3.bf16.msra.mxu1 %v4254_v38 }
 0x35b   : > { %4075 = vmatprep.subr.bf16.mxu1 %v4256_v39  ;;  %3501 = vmatprep.mubr.bf16.mxu1 %v2829_v13 }
 0x35d   : > { %4054 = vmatpush3.bf16.msra.mxu0 %v4257_v40 }
 0x35e   : > { %4055 = vmatprep.subr.bf16.mxu0 %v4259_v47  ;;  %4076 = vmatpush3.bf16.msra.mxu1 %v4258_v43 }
 0x35f   : > { %4077 = vmatprep.subr.bf16.mxu1 %v4260_v48 }
 0x361   : > { %4056 = vmatpush3.bf16.msra.mxu0 %v4261_v44 }
 0x362   : > { %4057 = vmatprep.subr.bf16.mxu0 %v4263_v50  ;;  %4078 = vmatpush3.bf16.msra.mxu1 %v4262_v46 }
 0x363   : > { %4079 = vmatprep.subr.bf16.mxu1 %v4264_v51 }
 0x365   : > { %4058 = vmatpush3.bf16.msra.mxu0 %v4265_v53 }
 0x366   : > { %4059 = vmatprep.subr.bf16.mxu0 %v4267_v55  ;;  %4080 = vmatpush3.bf16.msra.mxu1 %v4266_v56 }
 0x367   : > { %4081 = vmatprep.subr.bf16.mxu1 %v4268_v58 }
 0x369   : > { %4060 = vmatpush3.bf16.msra.mxu0 %v4269_v59 }
 0x36a   : > { %4061 = vmatprep.subr.bf16.mxu0 %v4271_v62  ;;  %4082 = vmatpush3.bf16.msra.mxu1 %v4270_v63 }
 0x36b   : > { %4083 = vmatprep.subr.bf16.mxu1 %v4272_v2 }
 0x36d   : > { %4062 = vmatpush3.bf16.msra.mxu0 %v4273_v3 }
 0x36e   : > { %4063 = vmatprep.subr.bf16.mxu0 %v4275_v6  ;;  %4084 = vmatpush3.bf16.msra.mxu1 %v4274_v45 }
 0x36f   : > { %4085 = vmatprep.subr.bf16.mxu1 %v4276_v16 }
 0x371   : > { %4064 = vmatpush3.bf16.msra.mxu0 %v4277_v7 }
 0x372   : > { %4086 = vmatpush3.bf16.msra.mxu1 %v4278_v14 }
 0x374   : > { %3462 = vmatmul.mubr.bf16.vlgmr.msra.gmra.mxu0 %v2826_v8 }
 0x375   : > { %3502 = vmatmul.mubr.bf16.vlgmr.msra.gmra.mxu1 %v2828_v17 }
 0x414   : > { %v4021_v9 = vpop.f32.mrf.mxu0 }
 0x415   : > { %v4043_v10 = vpop.f32.mrf.mxu1 }
 0x416   : > { %v4022_v11 = vpop.f32.mrf.mxu0 }
 0x417   : > { %v4044_v15 = vpop.f32.mrf.mxu1  ;;  %v4023_v22 = vadd.f32 %v4022_v11, %v4021_v9 }
 0x418   : > { %v4024_v18 = vpop.f32.mrf.mxu0  ;;  %v4045_v25 = vadd.f32 %v4044_v15, %v4043_v10 }
 0x419   : > { %v4046_v19 = vpop.f32.mrf.mxu1  ;;  %v3384_v24 = vadd.f32 %v4023_v22, %v3933_v23 }
 0x41a   : > { %v4025_v20 = vpop.f32.mrf.mxu0 }
 0x41b   : > { %v4047_v21 = vpop.f32.mrf.mxu1  ;;  %v3424_v29 = vadd.f32 %v4045_v25, %v3384_v24 }
 0x434   : > { %v4065_v26 = vpop.f32.mrf.mxu0 }
 0x435   : > { %v4087_v27 = vpop.f32.mrf.mxu1 }
 0x436   : > { %v4066_v28 = vpop.f32.mrf.mxu0 }
 0x437   : > { %v4067_v30 = vadd.f32 %v4066_v28, %v4065_v26  ;;  %v4088_v31 = vpop.f32.mrf.mxu1 }
 0x438   : > { %v4068_v12 = vpop.f32.mrf.mxu0  ;;  %v4089_v33 = vadd.f32 %v4088_v31, %v4087_v27 }
 0x439   : > { %v3464_v32 = vadd.f32 %v4067_v30, %v3424_v29  ;;  %v4090_v34 = vpop.f32.mrf.mxu1 }
 0x43a   : > { %v4069_v35 = vpop.f32.mrf.mxu0 }
 0x43b   : > { %v3504_v36 = vadd.f32 %v4089_v33, %v3464_v32  ;;  %v4091_v37 = vpop.f32.mrf.mxu1 }
 0x43d   : > { %3510 = vst.msk [vmem:[#allocation14] sm:$0x3] %vm3509_vm0, %v3504_v36 }
 0x43e PF: > { %p4155_p9 = scmp.eq.s32.totalorder %s4653_s11, 3  ;;  %s4576_s30 = smov [#allocation14]  }
 0x43f   : > { %s3520_s1 = sshll.u32 %s4576_s30, 4  ;;  %s3521_s1 = int_to_ptr.vmem [resolvable:$true] %s3520_s1 }
 0x440   : > { %s4465_s2 = scalar_lea.vmem %s3521_s1, 32  ;;  %p4472_p13 = scmp.lt.s32.totalorder %s3521_s1, %s3521_s1 }
 0x441   : > { %p4466_p10 = scmp.ne.s32.totalorder %s3521_s1, %s4465_s2  ;;  %p4473_p0 = scmp.lt.s32.totalorder %s4465_s2, %s4465_s2 }
 0x443   : > { %p4467_p11 = pnand %p4466_p10, %p4155_p9  ;;  %p4474_p2 = por %p4473_p0, %p4472_p13 }
 0x445   : > { %p4468_p5 = pneg %p4467_p11 }
 0x447   : > { %p4475_p1 = pnand %p4474_p2, %p4468_p5 }
 0x449   : > { %4478 = shalt.err (!%p4475_p1)
}
 0x44a   : > { %4118 = dma.vmem_to_hbm [thread:$0]  (%p4155_p9), %s3521_s1, 32, %s5377_s8, [#allocation5]  }
 0x44b   : > { %4538 = dma.done.wait (%p4155_p9), [#allocation5], 32  }
 0x44c   : > { %4540 = vsyncadd (%p4155_p9), [#allocation5], 4294967264 }
 0x44d PF: > { %s24_s10 = sadd.s32 1, %s4563_s10   ;;  %s5409_s18 = sld [smem:[#allocation23_spill]] }
 0x44e   : > { %p21_p3 = scmp.ge.s32.totalorder %s24_s10, 6   ;;  %s5410_s22 = sld [smem:[#allocation22_spill]] }
 0x44f   : > { %s5411_s27 = smov %s4547_s28  ;;  %s5412_s28 = smov %s4551_s29 }
 0x450   : > { %s5414_s30 = smov %s4559_s9  ;;  %23 = sbr.rel (!%p21_p3) target bundleno = 11 (0xb), region = 129 }
 0x453   : > { %s5413_s29 = smov %s5409_s18 }
 0x454   : > { %s5415_s9 = smov %s5410_s22 }
 0x455   :  { %3533 = vsyncpa [#allocation4], 1 }
 0x456   :  { %3535 = vsyncpa [#allocation4 + $0x1], 1 }
 0x457   :  { %3536 = vsyncpa [#allocation7], 1 }
 0x458   :  { %3537 = vsyncpa [#allocation10], 1 }
 0x459   :  { %3538 = vsyncpa [#allocation5], 1 }
 0x45a   :  { %3540 = vsyncpa [#allocation5 + $0x1], 1 }

</bundles_post_ra>
